<compile_context>
chip_gen: v7x
topology: tpu7x:2x2x1
jax: 0.10.0
libtpu: 0.0.40
codegen_flags: <defaults>
</compile_context>

<pallas_src>
import functools

import jax
import jax.numpy as jnp
from jax import lax
from jax.experimental import pallas as pl
from jax.experimental.pallas import tpu as pltpu


def _round_up(x, m):
    return ((x + m - 1) // m) * m


def _loss_sum_f32(x, t, smoothing):
    """Elementwise label-smoothed BCE-with-logits, summed in f32 (plain jnp helper)."""
    x = x.astype(jnp.float32)
    st = t.astype(jnp.float32) * (1.0 - smoothing) + 0.5 * smoothing
    loss = jnp.maximum(x, 0.0) - x * st + jnp.log1p(jnp.exp(-jnp.abs(x)))
    return jnp.sum(loss)


def _bce_smooth_partial_kernel(x_ref, t_ref, o_ref, *, smoothing, rows_valid_last, tm, tl):
    i = pl.program_id(0)

    x = x_ref[...].astype(jnp.float32)
    t = t_ref[...].astype(jnp.float32)

    # label smoothing
    st = t * (1.0 - smoothing) + 0.5 * smoothing

    # numerically-stable BCE with logits: max(x, 0) - x * t + log(1 + exp(-|x|))
    loss = jnp.maximum(x, 0.0) - x * st + jnp.log1p(jnp.exp(-jnp.abs(x)))

    last = pl.num_programs(0) - 1

    @pl.when(i != last)
    def _():
        # Steady state: every row of this block is valid (padding/overhang only exists
        # in the last block), so no masking here.
        o_ref[...] = jnp.sum(loss.reshape(tm // 8, 8, tl), axis=0)

    @pl.when(i == last)
    def _():
        # The last block may overhang the array (non-divisible grid). Discard those rows
        # with a block-local, statically known row count. jnp.where is a select, so any
        # NaN/Inf produced from out-of-bounds garbage in the dropped rows is harmless.
        row = lax.broadcasted_iota(jnp.int32, (tm, tl), 0)
        masked = jnp.where(row < rows_valid_last, loss, 0.0)
        o_ref[...] = jnp.sum(masked.reshape(tm // 8, 8, tl), axis=0)


def bce_label_smooth_loss(logits, target, smoothing=0.1, *, tm=4096, tl=128,
                          min_pallas_elems=4096):
    """Mean-reduced BCE-with-logits loss with label smoothing (matches the PyTorch module)."""
    assert logits.shape == target.shape
    n = logits.size
    assert n > 0

    # Keep native dtypes (bf16 logits / int-ish targets halve HBM traffic); cast is in-kernel.
    xf = logits.reshape(-1)
    tf = target.reshape(-1)

    # Small-input fast path: pallas_call launch + single grid step would dominate.
    if n < max(int(min_pallas_elems), 2 * tl):
        return _loss_sum_f32(xf, tf, smoothing) / jnp.float32(n)

    rows = n // tl
    tail = n - rows * tl  # 0 .. tl-1 elements handled outside the kernel

    if tail:
        # TODO(synk): this prefix slice may materialize a copy in XLA; it only triggers when
        # the flattened size is not a multiple of 128 (uncommon for dense logit maps).
        xk = xf[: rows * tl]
        tk = tf[: rows * tl]
    else:
        xk, tk = xf, tf  # zero-copy reshape below

    x2 = xk.reshape(rows, tl)
    t2 = tk.reshape(rows, tl)

    # --- tile sizing ---
    tm = _round_up(max(16, int(tm)), 16)          # multiple of 16: safe for bf16 packing too
    tm = min(tm, 8192)                            # keep VMEM need bounded on v7x (64 MiB)
    # Aim for >= ~4 grid steps (megacore sharding on v7x + DMA double-buffer overlap),
    # while keeping blocks at least 256 rows so per-step overhead stays amortized.
    tm = min(tm, max(256, _round_up(pl.cdiv(rows, 4), 16)))

    num_tiles = pl.cdiv(rows, tm)
    rows_valid_last = rows - (num_tiles - 1) * tm  # static Python int, 1..tm
    assert 0 < rows_valid_last <= tm

    kernel = functools.partial(
        _bce_smooth_partial_kernel,
        smoothing=float(smoothing),
        rows_valid_last=int(rows_valid_last),
        tm=tm, tl=tl,
    )

    # VMEM: 2 inputs x 2 pipeline buffers x block (native dtype) + f32 kernel temporaries.
    block_in_bytes = tm * tl * (x2.dtype.itemsize + t2.dtype.itemsize)
    block_f32 = tm * tl * 4
    vmem_need = 2 * block_in_bytes + 8 * block_f32
    vmem_limit = int(min(48 * 1024 * 1024, max(16 * 1024 * 1024, vmem_need)))

    cost = pl.CostEstimate(
        flops=7 * rows * tl,
        transcendentals=2 * rows * tl,
        bytes_accessed=rows * tl * (x2.dtype.itemsize + t2.dtype.itemsize)
        + num_tiles * 8 * tl * 4,
    )

    partials = pl.pallas_call(
        kernel,
        out_shape=jax.ShapeDtypeStruct((num_tiles * 8, tl), jnp.float32),
        grid_spec=pltpu.PrefetchScalarGridSpec(
            num_scalar_prefetch=0,
            grid=(num_tiles,),
            in_specs=[
                pl.BlockSpec((tm, tl), lambda i: (i, 0)),
                pl.BlockSpec((tm, tl), lambda i: (i, 0)),
            ],
            out_specs=pl.BlockSpec((8, tl), lambda i: (i, 0)),
        ),
        compiler_params=pltpu.CompilerParams(
            dimension_semantics=("parallel",),
            vmem_limit_bytes=vmem_limit,
        ),
        cost_estimate=cost,
    )(x2, t2)

    total = jnp.sum(partials)
    if tail:
        total = total + _loss_sum_f32(xf[rows * tl:], tf[rows * tl:], smoothing)
    return total / jnp.float32(n)


def _reference(logits, target, smoothing=0.1):
    x = logits.astype(jnp.float32)
    t = target.astype(jnp.float32) * (1.0 - smoothing) + 0.5 * smoothing
    loss = jnp.maximum(x, 0.0) - x * t + jnp.log1p(jnp.exp(-jnp.abs(x)))
    return jnp.mean(loss)


if __name__ == "__main__":
    key = jax.random.PRNGKey(0)
    k1, k2, k3, k4 = jax.random.split(key, 4)

    # 1) Small per-pixel classification map (NCHW) -> exercises the small-input fast path.
    B, C, H, W = 2, 4, 16, 16
    logits_s = jax.random.normal(k1, (B, C, H, W), dtype=jnp.float32)
    target_s = (jax.random.uniform(k2, (B, C, H, W)) > 0.5).astype(jnp.float32)
    loss_s = jax.block_until_ready(bce_label_smooth_loss(logits_s, target_s, smoothing=0.1))
    ref_s = _reference(logits_s, target_s, smoothing=0.1)
    assert jnp.allclose(loss_s, ref_s, atol=1e-5, rtol=1e-5), (loss_s, ref_s)

    # 2) Larger map -> Pallas path, including the non-multiple-of-128 tail and the
    #    partially-valid (overhanging) last grid block.
    B2, C2, H2, W2 = 2, 4, 97, 97   # 75272 elements, not a multiple of 128
    logits_l = jax.random.normal(k3, (B2, C2, H2, W2), dtype=jnp.float32)
    target_l = (jax.random.uniform(k4, (B2, C2, H2, W2)) > 0.5).astype(jnp.float32)
    loss_l = jax.block_until_ready(bce_label_smooth_loss(logits_l, target_l, smoothing=0.1))
    ref_l = _reference(logits_l, target_l, smoothing=0.1)
    assert jnp.allclose(loss_l, ref_l, atol=1e-5, rtol=1e-5), (loss_l, ref_l)

    # 3) bf16 logits go through the kernel in their native dtype (multiple-of-128 case,
    #    but the last grid block still overhangs and gets masked).
    logits_b = logits_l[..., :96].astype(jnp.bfloat16)   # 2*4*97*96 = 74496 = 582*128
    target_b = target_l[..., :96]
    loss_b = jax.block_until_ready(bce_label_smooth_loss(logits_b, target_b, smoothing=0.1))
    ref_b = _reference(logits_b, target_b, smoothing=0.1)
    assert jnp.allclose(loss_b, ref_b, atol=1e-4, rtol=1e-4), (loss_b, ref_b)

    print("KERNEL_OK")
</pallas_src>

<mosaic_0001>
module attributes {stable_mosaic.version = 11 : i64} {
  func.func @_bce_smooth_partial_kernel(%arg0: i32, %arg1: memref<256x128xf32, #tpu.memory_space<vmem>>, %arg2: memref<256x128xf32, #tpu.memory_space<vmem>>, %arg3: memref<8x128xf32, #tpu.memory_space<vmem>>) attributes {dimension_semantics = [#tpu.dimension_semantics<parallel>], iteration_bounds = array<i64: 3>, scalar_prefetch = 0 : i64, scratch_operands = 0 : i64, tpu.core_type = #tpu.core_type<tc>, window_params = [{transform_indices = @transform_0, window_bounds = array<i64: 256, 128>}, {transform_indices = @transform_1, window_bounds = array<i64: 256, 128>}, {transform_indices = @transform_2, window_bounds = array<i64: 8, 128>}]} {
    %c0 = arith.constant 0 : index
    %c0_0 = arith.constant 0 : index
    %0 = vector.load %arg1[%c0, %c0_0] : memref<256x128xf32, #tpu.memory_space<vmem>>, vector<256x128xf32>
    %c0_1 = arith.constant 0 : index
    %c0_2 = arith.constant 0 : index
    %1 = vector.load %arg2[%c0_1, %c0_2] : memref<256x128xf32, #tpu.memory_space<vmem>>, vector<256x128xf32>
    %cst = arith.constant 0.899999976 : f32
    %2 = vector.broadcast %cst : f32 to vector<256x128xf32>
    %3 = arith.mulf %1, %2 : vector<256x128xf32>
    %cst_3 = arith.constant 5.000000e-02 : f32
    %4 = vector.broadcast %cst_3 : f32 to vector<256x128xf32>
    %5 = arith.addf %3, %4 : vector<256x128xf32>
    %cst_4 = arith.constant 0.000000e+00 : f32
    %6 = vector.broadcast %cst_4 : f32 to vector<256x128xf32>
    %7 = arith.maximumf %0, %6 : vector<256x128xf32>
    %8 = arith.mulf %0, %5 : vector<256x128xf32>
    %9 = arith.subf %7, %8 : vector<256x128xf32>
    %10 = math.absf %0 : vector<256x128xf32>
    %cst_5 = arith.constant 0.000000e+00 : f32
    %11 = vector.broadcast %cst_5 : f32 to vector<256x128xf32>
    %12 = arith.subf %11, %10 : vector<256x128xf32>
    %13 = math.exp %12 : vector<256x128xf32>
    %14 = math.log1p %13 : vector<256x128xf32>
    %15 = arith.addf %9, %14 : vector<256x128xf32>
    %c2_i32 = arith.constant 2 : i32
    %16 = arith.cmpi ne, %arg0, %c2_i32 : i32
    %17 = arith.extui %16 : i1 to i32
    %c0_i32 = arith.constant 0 : i32
    %18 = arith.cmpi ne, %17, %c0_i32 : i32
    scf.if %18 {
      %22 = vector.shape_cast %15 : vector<256x128xf32> to vector<32x8x128xf32>
      %cst_8 = arith.constant dense<0.000000e+00> : vector<8x128xf32>
      %23 = vector.multi_reduction <add>, %22, %cst_8 [0] : vector<32x8x128xf32> to vector<8x128xf32>
      %c0_9 = arith.constant 0 : index
      %c0_10 = arith.constant 0 : index
      %24 = vector.load %arg3[%c0_9, %c0_10] : memref<8x128xf32, #tpu.memory_space<vmem>>, vector<8x128xf32>
      tpu.vector_store %arg3[%c0_9, %c0_10], %23 {strides = array<i32>} : memref<8x128xf32, #tpu.memory_space<vmem>>, vector<8x128xf32>,
    } else {
    }
    %c2_i32_6 = arith.constant 2 : i32
    %19 = arith.cmpi eq, %arg0, %c2_i32_6 : i32
    %20 = arith.extui %19 : i1 to i32
    %c0_i32_7 = arith.constant 0 : i32
    %21 = arith.cmpi ne, %20, %c0_i32_7 : i32
    scf.if %21 {
      %22 = tpu.iota {dimensions = array<i32: 0>} : vector<256x128xi32>
      %c76_i32 = arith.constant 76 : i32
      %23 = vector.broadcast %c76_i32 : i32 to vector<256x128xi32>
      %24 = arith.cmpi slt, %22, %23 : vector<256x128xi32>
      %cst_8 = arith.constant 0.000000e+00 : f32
      %25 = vector.broadcast %cst_8 : f32 to vector<256x128xf32>
      %26 = arith.select %24, %15, %25 : vector<256x128xi1>, vector<256x128xf32>
      %27 = vector.shape_cast %26 : vector<256x128xf32> to vector<32x8x128xf32>
      %cst_9 = arith.constant dense<0.000000e+00> : vector<8x128xf32>
      %28 = vector.multi_reduction <add>, %27, %cst_9 [0] : vector<32x8x128xf32> to vector<8x128xf32>
      %c0_10 = arith.constant 0 : index
      %c0_11 = arith.constant 0 : index
      %29 = vector.load %arg3[%c0_10, %c0_11] : memref<8x128xf32, #tpu.memory_space<vmem>>, vector<8x128xf32>
      tpu.vector_store %arg3[%c0_10, %c0_11], %28 {strides = array<i32>} : memref<8x128xf32, #tpu.memory_space<vmem>>, vector<8x128xf32>,
    } else {
    }
    return
  }
  func.func @transform_0(%arg0: i32) -> (i32, i32) {
    %c0_i32 = arith.constant 0 : i32
    %c0_i32_0 = arith.constant 0 : i32
    return %arg0, %c0_i32 : i32, i32
  }
  func.func @transform_1(%arg0: i32) -> (i32, i32) {
    %c0_i32 = arith.constant 0 : i32
    %c0_i32_0 = arith.constant 0 : i32
    return %arg0, %c0_i32 : i32, i32
  }
  func.func @transform_2(%arg0: i32) -> (i32, i32) {
    %c0_i32 = arith.constant 0 : i32
    %c0_i32_0 = arith.constant 0 : i32
    return %arg0, %c0_i32 : i32, i32
  }
}

</mosaic_0001>

<bundles_post_ra>
// kernel: tpu_custom_call.1
= control target key start
LH: loop header
LB: loop body
LE: loop exit
PB: predicated region body
PF: predicated region fallthrough
CT: control target
= control target key end

     0   :  { %7 = vsyncpa [#allocation3], 0  ;;  %s2856_s0 = inlined_call_operand.hbm [shape: f32[588,128], index: 0, kind: input, shape index: {}]   ;;  %s2857_s1 = inlined_call_operand.hbm [shape: f32[588,128], index: 1, kind: input, shape index: {}]   ;;  %s2858_s2 = inlined_call_operand.hbm [shape: f32[24,128], index: 2, kind: output, shape index: {}]  }
   0x1   :  { %9 = vsyncpa [#allocation3 + $0x1], 0 }
   0x2   :  { %10 = vsyncpa [#allocation6], 0 }
   0x3   :  { %12 = vsyncpa [#allocation6 + $0x1], 0 }
   0x4   :  { %13 = vsyncpa [#allocation4], 0 }
   0x5   :  { %15 = vsyncpa [#allocation4 + $0x1], 0  ;;  %s1524_s9 = smov 0   ;;  %s1526_s10 = smov 0  }
   0x6   :  { %s1528_s11 = smov 0   ;;  %s1530_s12 = smov 0  }
   0x7 LB: > { %s1545_s13 = sadd.s32 4294967295, %s1500_s12   ;;  %s1172_s14 = sadd.s32 4294967294, %s1500_s12   ;;  %s1500_s12 = sphi %s1530_s12, %s3301_s12   ;;  %s1496_s11 = sphi %s1528_s11, %s3300_s11   ;;  %s1492_s10 = sphi %s1526_s10, %s3299_s10   ;;  %s1488_s9 = sphi %s1524_s9, %s3298_s9  }
   0x8   : > { %s1549_s15 = sadd.s32 1, %s1500_s12   ;;  %s28_s16 = sadd.s32 1, %s1496_s11 }
   0x9   : > { %s25_s17 = ssub.s32 %s1500_s12, %s1549_s15  ;;  %p35_p0 = scmp.ne.s32.totalorder %s1496_s11, %s1492_s10 }
   0xa   : > { %p26_p1 = scmp.eq.s32.totalorder %s25_s17, 0  ;;  %p36_p2 = scmp.eq.s32.totalorder %s1500_s12, 0 }
   0xb   : > { %p41_p3 = scmp.ne.s32.totalorder %s1492_s10, %s1488_s9  ;;  %p42_p4 = scmp.eq.s32.totalorder %s1545_s13, 0 }
   0xc   : > { %s1561_s18 = scalar_select %p26_p1, %s1496_s11, %s28_s16  }
   0xd   : > { %p1563_p5 = por %p36_p2, %p35_p0  ;;  %p1567_p6 = por %p42_p4, %p41_p3 }
   0xe   : > { %p2859_p7 = scmp.eq.s32.totalorder %s1545_s13, 2  ;;  %p97_p8 = scmp.eq.s32.totalorder %s1172_s14, 2 }
   0xf   : > { %p1174_p11 = scmp.ge.s32.totalorder %s1500_s12, 3 }
  0x10   : > { %p1574_p9 = por %p2859_p7, %p35_p0  ;;  %p1578_p10 = por %p97_p8, %p41_p3 }
  0x11   : > { %113 = sbr.rel (%p1174_p11) target bundleno = 94 (0x5e), region = 16 }
  0x12   : > { %s2958_s21 = scalar_select %p1574_p9, 1, 0 }
  0x13   : > { %s2959_s22 = scalar_select %p1578_p10, 1, 0 }
  0x18   : > { %116 = sbr.rel (!%p1563_p5) target bundleno = 59 (0x3b), region = 20  ;;  %s117_s23 = sand.u32 (%p1563_p5), 1, %s1496_s11  }
  0x19   : > { %s1176_s24 = sshll.u32 (%p1563_p5), %s1500_s12, 5  ;;  %s1175_s25 = sshll.u32 (%p1563_p5), %s117_s23, 8 }
  0x1a   : > { %s123_s26 = ssub.s32 (%p1563_p5), 74, %s1176_s24  ;;  %s1590_s29 = scalar_lea.sflag (%p1563_p5), [#allocation3], %s117_s23 }
  0x1b   : > { %p124_p12 = scmp.lt.s32.totalorder (%p1563_p5), %s123_s26, 32  ;;  %s121_s30 = scalar_lea.vmem (%p1563_p5), [#allocation2], %s1175_s25 }
  0x1f   : > { %s3303_s26 = smov (!%p124_p12, %s123_s26), 32 }
  0x20   : > { %s1587_s27 = sshll.u32 %s3303_s26, 7 }
  0x21   : > { %s128_s28 = ssub.s32 4096, %s1587_s27 }
  0x22   : > { %129 = vsyncadd %s1590_s29, %s128_s28  ;;  %p1178_p13 = scmp.ne.s32.totalorder %s1587_s27, 0  ;;  %s1199_s3 = sshll.u32 %s1500_s12, 12 }
  0x23   : > { %s1598_s6 = scalar_lea.hbm %s2856_s0, %s1199_s3  ;;  %s134_s7 = sshll.u32 %s121_s30, 4  ;;  %s1600_s7 = int_to_ptr.vmem [resolvable:$true] %s134_s7 }
  0x24   : > { %s1374_s8 = scalar_lea.hbm %s1598_s6, %s1587_s27  ;;  %s1378_s17 = scalar_lea.hbm %s2856_s0, 9472 }
  0x25   : > { %p1375_p0 = scmp.ne.s32.totalorder %s1598_s6, %s1374_s8  ;;  %p1379_p3 = scmp.lt.u32.totalorder %s1598_s6, %s2856_s0 }
  0x26   : > { %p1380_p4 = scmp.lt.u32.totalorder %s1378_s17, %s1374_s8  ;;  %p1382_p11 = scmp.lt.u32.totalorder %s1374_s8, %s1598_s6 }
  0x27   : > { %p1376_p1 = pnand %p1375_p0, %p1178_p13 }
  0x28   : > { %p1381_p8 = por %p1380_p4, %p1379_p3 }
  0x29   : > { %p1377_p2 = pneg %p1376_p1 }
  0x2a   : > { %p1383_p12 = por %p1382_p11, %p1381_p8 }
  0x2c   : > { %p1384_p7 = pnand %p1383_p12, %p1377_p2 }
  0x2e   : > { %1387 = shalt.err (!%p1384_p7)
}
  0x2f   : > { %s1388_s25 = scalar_lea.vmem %s1600_s7, %s1587_s27  ;;  %s1502_s26 = smov [#allocation2]  }
  0x30   : > { %p1389_p0 = scmp.ne.s32.totalorder %s1600_s7, %s1388_s25  ;;  %s1392_s28 = sshll.u32 %s1502_s26, 4  ;;  %s1393_s28 = int_to_ptr.vmem [resolvable:$false] %s1392_s28 }
  0x31   : > { %s1394_s30 = scalar_lea.vmem %s1393_s28, 8192  ;;  %p1395_p9 = scmp.lt.s32.totalorder %s1600_s7, %s1393_s28 }
  0x32   : > { %p1390_p1 = pnand %p1389_p0, %p1178_p13  ;;  %p1396_p3 = scmp.lt.s32.totalorder %s1394_s30, %s1388_s25 }
  0x34   : > { %p1391_p10 = pneg %p1390_p1  ;;  %p1397_p4 = por %p1396_p3, %p1395_p9 }
  0x36   : > { %p1398_p8 = pnand %p1397_p4, %p1391_p10 }
  0x38   : > { %1401 = shalt.err (!%p1398_p8)
}
  0x39   : > { %s1503_s3 = smov 128   ;;  %s1504_s4 = smov 8  }
  0x3a   : > { %140 = dma.hbm_to_vmem [thread:$0]  (%p1178_p13), %s1598_s6, %s1587_s27, %s1600_s7, %s1590_s29, %s1503_s3, %s1503_s3, %s1504_s4  }
  0x3b PF: > { %143 = sbr.rel (!%p1563_p5) target bundleno = 94 (0x5e), region = 24  ;;  %s144_s5 = sand.u32 (%p1563_p5), 1, %s1496_s11  }
  0x3c   : > { %s1183_s8 = sshll.u32 (%p1563_p5), %s1500_s12, 5  ;;  %s1182_s14 = sshll.u32 (%p1563_p5), %s144_s5, 8 }
  0x3d   : > { %s150_s16 = ssub.s32 (%p1563_p5), 74, %s1183_s8  ;;  %s1634_s24 = scalar_lea.sflag (%p1563_p5), [#allocation6], %s144_s5 }
  0x3e   : > { %p151_p7 = scmp.lt.s32.totalorder (%p1563_p5), %s150_s16, 32  ;;  %s148_s27 = scalar_lea.vmem (%p1563_p5), [#allocation5], %s1182_s14 }
  0x42   : > { %s3305_s16 = smov (!%p151_p7, %s150_s16), 32 }
  0x43   : > { %s1631_s17 = sshll.u32 %s3305_s16, 7 }
  0x44   : > { %s155_s23 = ssub.s32 4096, %s1631_s17 }
  0x45   : > { %156 = vsyncadd %s1634_s24, %s155_s23  ;;  %p1185_p5 = scmp.ne.s32.totalorder %s1631_s17, 0  ;;  %s1200_s19 = sshll.u32 %s1500_s12, 12 }
  0x46   : > { %s1642_s7 = scalar_lea.hbm %s2857_s1, %s1200_s19  ;;  %s161_s25 = sshll.u32 %s148_s27, 4  ;;  %s1644_s25 = int_to_ptr.vmem [resolvable:$true] %s161_s25 }
  0x47   : > { %s1402_s26 = scalar_lea.hbm %s1642_s7, %s1631_s17  ;;  %s1406_s3 = scalar_lea.hbm %s2857_s1, 9472 }
  0x48   : > { %p1403_p9 = scmp.ne.s32.totalorder %s1642_s7, %s1402_s26  ;;  %p1407_p2 = scmp.lt.u32.totalorder %s1642_s7, %s2857_s1 }
  0x49   : > { %p1408_p11 = scmp.lt.u32.totalorder %s1406_s3, %s1402_s26  ;;  %p1410_p0 = scmp.lt.u32.totalorder %s1402_s26, %s1642_s7 }
  0x4a   : > { %p1404_p10 = pnand %p1403_p9, %p1185_p5 }
  0x4b   : > { %p1409_p12 = por %p1408_p11, %p1407_p2 }
  0x4c   : > { %p1405_p13 = pneg %p1404_p10 }
  0x4d   : > { %p1411_p1 = por %p1410_p0, %p1409_p12 }
  0x4f   : > { %p1412_p3 = pnand %p1411_p1, %p1405_p13 }
  0x51   : > { %1415 = shalt.err (!%p1412_p3)
}
  0x52   : > { %s1416_s8 = scalar_lea.vmem %s1644_s25, %s1631_s17  ;;  %s1505_s14 = smov [#allocation5]  }
  0x53   : > { %p1417_p4 = scmp.ne.s32.totalorder %s1644_s25, %s1416_s8  ;;  %s1420_s16 = sshll.u32 %s1505_s14, 4  ;;  %s1421_s16 = int_to_ptr.vmem [resolvable:$false] %s1420_s16 }
  0x54   : > { %s1422_s23 = scalar_lea.vmem %s1421_s16, 8192  ;;  %p1423_p9 = scmp.lt.s32.totalorder %s1644_s25, %s1421_s16 }
  0x55   : > { %p1418_p8 = pnand %p1417_p4, %p1185_p5  ;;  %p1424_p10 = scmp.lt.s32.totalorder %s1422_s23, %s1416_s8 }
  0x57   : > { %p1419_p7 = pneg %p1418_p8  ;;  %p1425_p2 = por %p1424_p10, %p1423_p9 }
  0x59   : > { %p1426_p11 = pnand %p1425_p2, %p1419_p7 }
  0x5b   : > { %1429 = shalt.err (!%p1426_p11)
}
  0x5c   : > { %s1506_s27 = smov 128   ;;  %s1507_s19 = smov 8  }
  0x5d   : > { %167 = dma.hbm_to_vmem [thread:$0]  (%p1185_p5), %s1642_s7, %s1631_s17, %s1644_s25, %s1634_s24, %s1506_s27, %s1506_s27, %s1507_s19  }
  0x5e PF: > { %p1189_p13 = scmp.ge.s32.totalorder %s1500_s12, 1  ;;  %p169_p12 = scmp.lt.s32.totalorder %s1500_s12, 4 }
  0x60   : > { %p170_p0 = pnand %p1189_p13, %p169_p12 }
  0x62   : > { %173 = sbr.rel (%p170_p0) target bundleno = 408 (0x198), region = 28 }
  0x69   : > { %s1674_s29 = sand.u32 1, %s1492_s10  }
  0x6a   : > { %s1190_s6 = sshll.u32 %s1674_s29, 8  ;;  %s176_s26 = scalar_lea.sflag [#allocation3], %s1674_s29 }
  0x6b   : > { %s1678_s28 = scalar_lea.vmem [#allocation2], %s1190_s6 }
  0x6c   : > { %1475 = dma.done.wait (%p1567_p6), %s176_s26, 4096  }
  0x6d   : > { %1477 = vsyncadd (%p1567_p6), %s176_s26, 4294963200  ;;  %s185_s17 = scalar_lea.sflag [#allocation6], %s1674_s29  ;;  %s1685_s24 = scalar_lea.vmem [#allocation5], %s1190_s6 }
  0x6e   : > { %1479 = dma.done.wait (%p1567_p6), %s185_s17, 4096  }
  0x6f   : > { %1481 = vsyncadd (%p1567_p6), %s185_s17, 4294963200  ;;  %s1192_s7 = sshll.u32 %s1674_s29, 3  ;;  %v1693_v0 = vld [vmem:[%s1678_s28] sm:$0xff]  ;;  %v1696_v1 = vld [vmem:[%s1678_s28 + $0x8] sm:$0xff]  ;;  %p3295_p6 = scmp.eq.s32.totalorder %s1545_s13, 2 }
  0x70   : > { %v1699_v2 = vld [vmem:[%s1678_s28 + $0x10] sm:$0xff]  ;;  %v1702_v3 = vld [vmem:[%s1678_s28 + $0x18] sm:$0xff]  ;;  %v1705_v4 = vld [vmem:[%s1678_s28 + $0x20] sm:$0xff]  ;;  %s2787_s20 = scalar_lea.vmem [#allocation7], %s1192_s7 }
  0x71   : > { %v1708_v5 = vld [vmem:[%s1678_s28 + $0x28] sm:$0xff]  ;;  %v1711_v6 = vld [vmem:[%s1678_s28 + $0x30] sm:$0xff]  ;;  %v1714_v7 = vld [vmem:[%s1678_s28 + $0x38] sm:$0xff] }
  0x72   : > { %v1717_v8 = vld [vmem:[%s1678_s28 + $0x40] sm:$0xff]  ;;  %v1723_v12 = vld [vmem:[%s1678_s28 + $0x48] sm:$0xff]  ;;  %v1726_v13 = vld [vmem:[%s1678_s28 + $0x50] sm:$0xff] }
  0x73   : > { %v1729_v14 = vld [vmem:[%s1678_s28 + $0x58] sm:$0xff]  ;;  %v1735_v18 = vld [vmem:[%s1678_s28 + $0x60] sm:$0xff]  ;;  %v1738_v19 = vld [vmem:[%s1678_s28 + $0x68] sm:$0xff] }
  0x74   : > { %2960 = vst [vmem:[#allocation11_spill] sm:$0xff] %v1729_v14  ;;  %2961 = vst [vmem:[#allocation12_spill] sm:$0xff] %v1735_v18  ;;  %v1741_v20 = vld [vmem:[%s1678_s28 + $0x70] sm:$0xff]  ;;  %v1747_v24 = vld [vmem:[%s1678_s28 + $0x78] sm:$0xff] }
  0x75   : > { %2962 = vst [vmem:[#allocation13_spill] sm:$0xff] %v1738_v19  ;;  %2963 = vst [vmem:[#allocation14_spill] sm:$0xff] %v1741_v20  ;;  %v1750_v25 = vld [vmem:[%s1678_s28 + $0x80] sm:$0xff]  ;;  %v1753_v26 = vld [vmem:[%s1678_s28 + $0x88] sm:$0xff] }
  0x76   : > { %2964 = vst [vmem:[#allocation15_spill] sm:$0xff] %v1747_v24  ;;  %2965 = vst [vmem:[#allocation16_spill] sm:$0xff] %v1750_v25  ;;  %v1759_v30 = vld [vmem:[%s1678_s28 + $0x90] sm:$0xff]  ;;  %v1762_v31 = vld [vmem:[%s1678_s28 + $0x98] sm:$0xff] }
  0x77   : > { %2966 = vst [vmem:[#allocation17_spill] sm:$0xff] %v1753_v26  ;;  %2967 = vst [vmem:[#allocation18_spill] sm:$0xff] %v1759_v30  ;;  %v1765_v32 = vld [vmem:[%s1678_s28 + $0xa0] sm:$0xff]  ;;  %v1771_v36 = vld [vmem:[%s1678_s28 + $0xa8] sm:$0xff] }
  0x78   : > { %2968 = vst [vmem:[#allocation19_spill] sm:$0xff] %v1762_v31  ;;  %2969 = vst [vmem:[#allocation20_spill] sm:$0xff] %v1765_v32  ;;  %v1774_v37 = vld [vmem:[%s1678_s28 + $0xb0] sm:$0xff]  ;;  %v1777_v38 = vld [vmem:[%s1678_s28 + $0xb8] sm:$0xff] }
  0x79   : > { %2970 = vst [vmem:[#allocation21_spill] sm:$0xff] %v1771_v36  ;;  %2971 = vst [vmem:[#allocation22_spill] sm:$0xff] %v1774_v37  ;;  %v1783_v42 = vld [vmem:[%s1678_s28 + $0xc0] sm:$0xff]  ;;  %v1786_v43 = vld [vmem:[%s1678_s28 + $0xc8] sm:$0xff] }
  0x7a   : > { %2972 = vst [vmem:[#allocation23_spill] sm:$0xff] %v1777_v38  ;;  %2973 = vst [vmem:[#allocation24_spill] sm:$0xff] %v1783_v42  ;;  %v256_v44 = vld [vmem:[%s1685_s24] sm:$0xff]  ;;  %v1793_v48 = vld [vmem:[%s1678_s28 + $0xd0] sm:$0xff] }
  0x7b   : > { %2974 = vst [vmem:[#allocation25_spill] sm:$0xff] %v1786_v43  ;;  %2975 = vst [vmem:[#allocation26_spill] sm:$0xff] %v1793_v48  ;;  %v1796_v49 = vld [vmem:[%s1678_s28 + $0xd8] sm:$0xff]  ;;  %v257_v50 = vld [vmem:[%s1685_s24 + $0x8] sm:$0xff]  ;;  %v288_v53 = vmul.f32 0.9, %v256_v44 }
  0x7c   : > { %2976 = vst [vmem:[#allocation27_spill] sm:$0xff] %v1796_v49  ;;  %v1803_v54 = vld [vmem:[%s1678_s28 + $0xe0] sm:$0xff]  ;;  %v1806_v55 = vld [vmem:[%s1678_s28 + $0xe8] sm:$0xff]  ;;  %v258_v56 = vld [vmem:[%s1685_s24 + $0x10] sm:$0xff]  ;;  %v289_v59 = vmul.f32 0.9, %v257_v50 }
  0x7d   : > { %2977 = vst [vmem:[#allocation28_spill] sm:$0xff] %v1803_v54  ;;  %2978 = vst [vmem:[#allocation29_spill] sm:$0xff] %v1806_v55  ;;  %v1813_v60 = vld [vmem:[%s1678_s28 + $0xf0] sm:$0xff]  ;;  %v259_v61 = vld [vmem:[%s1685_s24 + $0x18] sm:$0xff]  ;;  %v290_v44 = vmul.f32 0.9, %v258_v56 }
  0x7e   : > { %2979 = vst [vmem:[#allocation30_spill] sm:$0xff] %v1813_v60  ;;  %v260_v62 = vld [vmem:[%s1685_s24 + $0x20] sm:$0xff]  ;;  %v261_v63 = vld [vmem:[%s1685_s24 + $0x28] sm:$0xff]  ;;  %v1820_v51 = vld [vmem:[%s1678_s28 + $0xf8] sm:$0xff]  ;;  %v291_v33 = vmul.f32 0.9, %v259_v61 }
  0x7f   : > { %2980 = vst [vmem:[#allocation31_spill] sm:$0xff] %v1820_v51  ;;  %v262_v57 = vld [vmem:[%s1685_s24 + $0x30] sm:$0xff]  ;;  %v263_v58 = vld [vmem:[%s1685_s24 + $0x38] sm:$0xff]  ;;  %v264_v47 = vld [vmem:[%s1685_s24 + $0x40] sm:$0xff]  ;;  %v292_v27 = vmul.f32 0.9, %v260_v62 }
  0x80   : > { %v265_v45 = vld [vmem:[%s1685_s24 + $0x48] sm:$0xff]  ;;  %v266_v41 = vld [vmem:[%s1685_s24 + $0x50] sm:$0xff]  ;;  %v267_v40 = vld [vmem:[%s1685_s24 + $0x58] sm:$0xff]  ;;  %v293_v21 = vmul.f32 0.9, %v261_v63 }
  0x81   : > { %v268_v39 = vld [vmem:[%s1685_s24 + $0x60] sm:$0xff]  ;;  %v269_v35 = vld [vmem:[%s1685_s24 + $0x68] sm:$0xff]  ;;  %v270_v34 = vld [vmem:[%s1685_s24 + $0x70] sm:$0xff]  ;;  %v294_v17 = vmul.f32 0.9, %v262_v57 }
  0x82   : > { %v271_v46 = vld [vmem:[%s1685_s24 + $0x78] sm:$0xff]  ;;  %v272_v29 = vld [vmem:[%s1685_s24 + $0x80] sm:$0xff]  ;;  %v273_v28 = vld [vmem:[%s1685_s24 + $0x88] sm:$0xff]  ;;  %v295_v15 = vmul.f32 0.9, %v263_v58 }
  0x83   : > { %v274_v23 = vld [vmem:[%s1685_s24 + $0x90] sm:$0xff]  ;;  %v275_v52 = vld [vmem:[%s1685_s24 + $0x98] sm:$0xff]  ;;  %v276_v22 = vld [vmem:[%s1685_s24 + $0xa0] sm:$0xff]  ;;  %v296_v11 = vmul.f32 0.9, %v264_v47 }
  0x84   : > { %v277_v16 = vld [vmem:[%s1685_s24 + $0xa8] sm:$0xff]  ;;  %v278_v61 = vld [vmem:[%s1685_s24 + $0xb0] sm:$0xff]  ;;  %v279_v50 = vld [vmem:[%s1685_s24 + $0xb8] sm:$0xff]  ;;  %v297_v60 = vmul.f32 0.9, %v265_v45 }
  0x85   : > { %v280_v10 = vld [vmem:[%s1685_s24 + $0xc0] sm:$0xff]  ;;  %v281_v9 = vld [vmem:[%s1685_s24 + $0xc8] sm:$0xff]  ;;  %v282_v62 = vld [vmem:[%s1685_s24 + $0xd0] sm:$0xff]  ;;  %v298_v56 = vmul.f32 0.9, %v266_v41 }
  0x86   : > { %v299_v51 = vmul.f32 0.9, %v267_v40  ;;  %v283_v55 = vld [vmem:[%s1685_s24 + $0xd8] sm:$0xff]  ;;  %v284_v54 = vld [vmem:[%s1685_s24 + $0xe0] sm:$0xff]  ;;  %v300_v49 = vmul.f32 0.9, %v268_v39 }
  0x87   : > { %v301_v48 = vmul.f32 0.9, %v269_v35  ;;  %v302_v63 = vmul.f32 0.9, %v270_v34  ;;  %v285_v57 = vld [vmem:[%s1685_s24 + $0xe8] sm:$0xff]  ;;  %v286_v43 = vld [vmem:[%s1685_s24 + $0xf0] sm:$0xff] }
  0x88   : > { %v303_v42 = vmul.f32 0.9, %v271_v46  ;;  %v304_v38 = vmul.f32 0.9, %v272_v29  ;;  %v305_v37 = vmul.f32 0.9, %v273_v28 }
  0x89   : > { %v287_v36 = vld [vmem:[%s1685_s24 + $0xf8] sm:$0xff]  ;;  %v306_v58 = vmul.f32 0.9, %v274_v23  ;;  %v307_v47 = vmul.f32 0.9, %v275_v52 }
  0x8a   : > { %v308_v32 = vmul.f32 0.9, %v276_v22  ;;  %v309_v31 = vmul.f32 0.9, %v277_v16  ;;  %v310_v30 = vmul.f32 0.9, %v278_v61 }
  0x8b   : > { %v311_v26 = vmul.f32 0.9, %v279_v50  ;;  %v312_v45 = vmul.f32 0.9, %v280_v10  ;;  %v313_v41 = vmul.f32 0.9, %v281_v9 }
  0x8c   : > { %v314_v40 = vmul.f32 0.9, %v282_v62  ;;  %v315_v25 = vmul.f32 0.9, %v283_v55  ;;  %v316_v24 = vmul.f32 0.9, %v284_v54 }
  0x8d   : > { %v320_v39 = vadd.f32 0.05, %v288_v53  ;;  %v317_v35 = vmul.f32 0.9, %v285_v57  ;;  %v318_v34 = vmul.f32 0.9, %v286_v43 }
  0x8e   : > { %v321_v20 = vadd.f32 0.05, %v289_v59  ;;  %v319_v19 = vmul.f32 0.9, %v287_v36  ;;  %v322_v46 = vadd.f32 0.05, %v290_v44 }
  0x8f   : > { %v323_v29 = vadd.f32 0.05, %v291_v33  ;;  %v324_v28 = vadd.f32 0.05, %v292_v27  ;;  %v325_v18 = vadd.f32 0.05, %v293_v21  ;;  %v384_v50 = vmul.f32 %v320_v39, %v1693_v0 }
  0x90   : > { %v326_v23 = vadd.f32 0.05, %v294_v17  ;;  %v327_v52 = vadd.f32 0.05, %v295_v15  ;;  %v328_v22 = vadd.f32 0.05, %v296_v11  ;;  %v385_v54 = vmul.f32 %v321_v20, %v1696_v1 }
  0x91   : > { %v329_v16 = vadd.f32 0.05, %v297_v60  ;;  %v330_v10 = vadd.f32 0.05, %v298_v56  ;;  %v331_v9 = vadd.f32 0.05, %v299_v51  ;;  %v386_v36 = vmul.f32 %v322_v46, %v1699_v2 }
  0x92   : > { %v332_v61 = vadd.f32 0.05, %v300_v49  ;;  %v333_v53 = vadd.f32 0.05, %v301_v48  ;;  %v334_v55 = vadd.f32 0.05, %v302_v63  ;;  %v387_v17 = vmul.f32 %v323_v29, %v1702_v3 }
  0x93   : > { %v335_v43 = vadd.f32 0.05, %v303_v42  ;;  %v336_v59 = vadd.f32 0.05, %v304_v38  ;;  %v337_v33 = vadd.f32 0.05, %v305_v37  ;;  %v388_v60 = vmul.f32 %v324_v28, %v1705_v4 }
  0x94   : > { %v338_v27 = vadd.f32 0.05, %v306_v58  ;;  %v339_v15 = vadd.f32 0.05, %v307_v47  ;;  %v340_v11 = vadd.f32 0.05, %v308_v32  ;;  %v389_v20 = vmul.f32 %v325_v18, %v1708_v5 }
  0x95   : > { %v341_v21 = vadd.f32 0.05, %v309_v31  ;;  %v342_v44 = vadd.f32 0.05, %v310_v30  ;;  %v343_v51 = vadd.f32 0.05, %v311_v26  ;;  %v390_v62 = vmul.f32 %v326_v23, %v1711_v6 }
  0x96   : > { %v344_v49 = vadd.f32 0.05, %v312_v45  ;;  %v345_v48 = vadd.f32 0.05, %v313_v41  ;;  %v346_v56 = vadd.f32 0.05, %v314_v40  ;;  %v391_v57 = vmul.f32 %v327_v52, %v1714_v7 }
  0x97   : > { %v347_v42 = vadd.f32 0.05, %v315_v25  ;;  %v348_v38 = vadd.f32 0.05, %v316_v24  ;;  %v349_v37 = vadd.f32 0.05, %v317_v35  ;;  %v392_v31 = vmul.f32 %v328_v22, %v1717_v8 }
  0x98   : > { %v350_v63 = vadd.f32 0.05, %v318_v34  ;;  %v351_v58 = vadd.f32 0.05, %v319_v19  ;;  %v393_v32 = vmul.f32 %v329_v16, %v1723_v12  ;;  %v394_v26 = vmul.f32 %v330_v10, %v1726_v13  ;;  %v2981_v18 = vld [vmem:[#allocation12_spill] sm:$0xff]  ;;  %v2982_v45 = vld [vmem:[#allocation13_spill] sm:$0xff] }
  0x99   : > { %v395_v30 = vmul.f32 %v331_v9, %v1729_v14  ;;  %v396_v47 = vmul.f32 %v332_v61, %v2981_v18  ;;  %v397_v25 = vmul.f32 %v333_v53, %v2982_v45  ;;  %v2983_v41 = vld [vmem:[#allocation14_spill] sm:$0xff]  ;;  %v2984_v24 = vld [vmem:[#allocation15_spill] sm:$0xff]  ;;  %v2985_v35 = vld [vmem:[#allocation16_spill] sm:$0xff] }
  0x9a   : > { %v398_v40 = vmul.f32 %v334_v55, %v2983_v41  ;;  %v399_v39 = vmul.f32 %v335_v43, %v2984_v24  ;;  %v400_v34 = vmul.f32 %v336_v59, %v2985_v35  ;;  %v2986_v46 = vld [vmem:[#allocation17_spill] sm:$0xff]  ;;  %v2987_v29 = vld [vmem:[#allocation18_spill] sm:$0xff]  ;;  %v2988_v23 = vld [vmem:[#allocation19_spill] sm:$0xff] }
  0x9b   : > { %v401_v19 = vmul.f32 %v337_v33, %v2986_v46  ;;  %v402_v28 = vmul.f32 %v338_v27, %v2987_v29  ;;  %v403_v52 = vmul.f32 %v339_v15, %v2988_v23  ;;  %v2989_v22 = vld [vmem:[#allocation20_spill] sm:$0xff]  ;;  %v2990_v10 = vld [vmem:[#allocation21_spill] sm:$0xff]  ;;  %v2991_v14 = vld [vmem:[#allocation22_spill] sm:$0xff] }
  0x9c   : > { %v404_v16 = vmul.f32 %v340_v11, %v2989_v22  ;;  %v405_v9 = vmul.f32 %v341_v21, %v2990_v10  ;;  %v406_v61 = vmul.f32 %v342_v44, %v2991_v14  ;;  %v2992_v18 = vld [vmem:[#allocation23_spill] sm:$0xff]  ;;  %v2993_v45 = vld [vmem:[#allocation24_spill] sm:$0xff]  ;;  %v2994_v41 = vld [vmem:[#allocation25_spill] sm:$0xff] }
  0x9d   : > { %v407_v53 = vmul.f32 %v343_v51, %v2992_v18  ;;  %v408_v55 = vmul.f32 %v344_v49, %v2993_v45  ;;  %v409_v43 = vmul.f32 %v345_v48, %v2994_v41  ;;  %v2995_v24 = vld [vmem:[#allocation26_spill] sm:$0xff]  ;;  %v2996_v35 = vld [vmem:[#allocation27_spill] sm:$0xff]  ;;  %v2997_v46 = vld [vmem:[#allocation28_spill] sm:$0xff]  ;;  %v3001_v51 = vmax.f32 %v1693_v0, 0.0 }
  0x9e   : > { %v410_v59 = vmul.f32 %v346_v56, %v2995_v24  ;;  %v411_v33 = vmul.f32 %v347_v42, %v2996_v35  ;;  %v1881_v27 = vmul.f32 %v348_v38, %v2997_v46  ;;  %v2998_v15 = vld [vmem:[#allocation29_spill] sm:$0xff]  ;;  %v2999_v11 = vld [vmem:[#allocation30_spill] sm:$0xff]  ;;  %v3000_v44 = vld [vmem:[#allocation31_spill] sm:$0xff]  ;;  %v3003_v48 = vmax.f32 %v1696_v1, 0.0 }
  0x9f   : > { %v1884_v23 = vmul.f32 %v349_v37, %v2998_v15  ;;  %v1887_v21 = vmul.f32 %v350_v63, %v2999_v11  ;;  %v1890_v14 = vmul.f32 %v351_v58, %v3000_v44  ;;  %v1894_v49 = vsub.f32 %v3001_v51, %v384_v50 }
  0xa0   : > { %v1898_v56 = vsub.f32 %v3003_v48, %v385_v54  ;;  %v3005_v42 = vmax.f32 %v1699_v2, 0.0  ;;  %v3007_v37 = vmax.f32 %v1702_v3, 0.0  ;;  %v3009_v63 = vmax.f32 %v1705_v4, 0.0 }
  0xa1   : > { %3002 = vst [vmem:[#allocation18_spill] sm:$0xff] %v1894_v49  ;;  %v3011_v44 = vmax.f32 %v1708_v5, 0.0  ;;  %v3013_v51 = vmax.f32 %v1711_v6, 0.0  ;;  %v3015_v48 = vmax.f32 %v1714_v7, 0.0 }
  0xa2   : > { %3004 = vst [vmem:[#allocation20_spill] sm:$0xff] %v1898_v56  ;;  %v1902_v38 = vsub.f32 %v3005_v42, %v386_v36  ;;  %v1906_v15 = vsub.f32 %v3007_v37, %v387_v17  ;;  %v1910_v58 = vsub.f32 %v3009_v63, %v388_v60  ;;  %v3017_v42 = vmax.f32 %v1717_v8, 0.0 }
  0xa3   : > { %v1914_v50 = vsub.f32 %v3011_v44, %v389_v20  ;;  %v1918_v54 = vsub.f32 %v3013_v51, %v390_v62  ;;  %v1922_v36 = vsub.f32 %v3015_v48, %v391_v57  ;;  %v3019_v37 = vmax.f32 %v1723_v12, 0.0  ;;  %v3023_v44 = vld [vmem:[#allocation11_spill] sm:$0xff]  ;;  %v3026_v51 = vld [vmem:[#allocation12_spill] sm:$0xff]  ;;  %v3029_v48 = vld [vmem:[#allocation13_spill] sm:$0xff] }
  0xa4   : > { %3006 = vst [vmem:[#allocation21_spill] sm:$0xff] %v1902_v38  ;;  %3008 = vst [vmem:[#allocation23_spill] sm:$0xff] %v1906_v15  ;;  %v1926_v17 = vsub.f32 %v3017_v42, %v392_v31  ;;  %v3021_v63 = vmax.f32 %v1726_v13, 0.0  ;;  %v3032_v42 = vld [vmem:[#allocation14_spill] sm:$0xff] }
  0xa5   : > { %3010 = vst [vmem:[#allocation24_spill] sm:$0xff] %v1910_v58  ;;  %3012 = vst [vmem:[#allocation25_spill] sm:$0xff] %v1914_v50  ;;  %v1930_v60 = vsub.f32 %v3019_v37, %v393_v32  ;;  %v3024_v50 = vmax.f32 %v3023_v44, 0.0  ;;  %v3035_v37 = vld [vmem:[#allocation15_spill] sm:$0xff] }
  0xa6   : > { %3014 = vst [vmem:[#allocation26_spill] sm:$0xff] %v1918_v54  ;;  %3016 = vst [vmem:[#allocation27_spill] sm:$0xff] %v1922_v36  ;;  %v1934_v20 = vsub.f32 %v3021_v63, %v394_v26  ;;  %v3027_v54 = vmax.f32 %v3026_v51, 0.0  ;;  %v3030_v36 = vmax.f32 %v3029_v48, 0.0  ;;  %v3038_v63 = vld [vmem:[#allocation16_spill] sm:$0xff] }
  0xa7   : > { %3018 = vst [vmem:[#allocation28_spill] sm:$0xff] %v1926_v17  ;;  %3020 = vst [vmem:[#allocation30_spill] sm:$0xff] %v1930_v60  ;;  %v1938_v62 = vsub.f32 %v3024_v50, %v395_v30  ;;  %v3033_v17 = vmax.f32 %v3032_v42, 0.0  ;;  %v3036_v60 = vmax.f32 %v3035_v37, 0.0  ;;  %v3041_v50 = vld [vmem:[#allocation17_spill] sm:$0xff] }
  0xa8   : > { %3022 = vst [vmem:[#allocation32_spill] sm:$0xff] %v1934_v20  ;;  %v1942_v57 = vsub.f32 %v3027_v54, %v396_v47  ;;  %v1946_v31 = vsub.f32 %v3030_v36, %v397_v25  ;;  %v3039_v20 = vmax.f32 %v3038_v63, 0.0  ;;  %v3044_v54 = vmax.f32 %v2987_v29, 0.0  ;;  %v3046_v36 = vld [vmem:[#allocation19_spill] sm:$0xff] }
  0xa9   : > { %3025 = vst [vmem:[#allocation11_spill] sm:$0xff] %v1938_v62  ;;  %v1950_v32 = vsub.f32 %v3033_v17, %v398_v40  ;;  %v1954_v26 = vsub.f32 %v3036_v60, %v399_v39  ;;  %v3042_v62 = vmax.f32 %v3041_v50, 0.0  ;;  %v3049_v17 = vmax.f32 %v2989_v22, 0.0 }
  0xaa   : > { %3028 = vst [vmem:[#allocation12_spill] sm:$0xff] %v1942_v57  ;;  %3031 = vst [vmem:[#allocation13_spill] sm:$0xff] %v1946_v31  ;;  %v1958_v30 = vsub.f32 %v3039_v20, %v400_v34  ;;  %v1966_v25 = vsub.f32 %v3044_v54, %v402_v28  ;;  %v3047_v31 = vmax.f32 %v3046_v36, 0.0  ;;  %v448_v60 = vand.u32 2147483647, %v1693_v0 }
  0xab   : > { %3034 = vst [vmem:[#allocation14_spill] sm:$0xff] %v1950_v32  ;;  %3037 = vst [vmem:[#allocation15_spill] sm:$0xff] %v1954_v26  ;;  %v1962_v47 = vsub.f32 %v3042_v62, %v401_v19  ;;  %v1974_v39 = vsub.f32 %v3049_v17, %v404_v16  ;;  %v449_v34 = vand.u32 2147483647, %v1696_v1  ;;  %v3051_v20 = vmax.f32 %v2990_v10, 0.0 }
  0xac   : > { %3040 = vst [vmem:[#allocation16_spill] sm:$0xff] %v1958_v30  ;;  %3045 = vst [vmem:[#allocation33_spill] sm:$0xff] %v1966_v25  ;;  %v1970_v40 = vsub.f32 %v3047_v31, %v403_v52  ;;  %v450_v62 = vand.u32 2147483647, %v1699_v2  ;;  %v451_v28 = vand.u32 2147483647, %v1702_v3 }
  0xad   : > { %3043 = vst [vmem:[#allocation17_spill] sm:$0xff] %v1962_v47  ;;  %3050 = vst [vmem:[#allocation34_spill] sm:$0xff] %v1974_v39  ;;  %v1980_v19 = vsub.f32 %v3051_v20, %v405_v9  ;;  %v452_v54 = vand.u32 2147483647, %v1705_v4  ;;  %v3053_v52 = vld [vmem:[#allocation22_spill] sm:$0xff]  ;;  %v3056_v17 = vmax.f32 %v2992_v18, 0.0 }
  0xae   : > { %3048 = vst [vmem:[#allocation19_spill] sm:$0xff] %v1970_v40  ;;  %v3054_v31 = vmax.f32 %v3053_v52, 0.0  ;;  %v453_v16 = vand.u32 2147483647, %v1708_v5  ;;  %v454_v0 = vand.u32 2147483647, %v1711_v6 }
  0xaf   : > { %3052 = vst [vmem:[#allocation35_spill] sm:$0xff] %v1980_v19  ;;  %v455_v1 = vand.u32 2147483647, %v1714_v7  ;;  %v1994_v9 = vsub.f32 %v3056_v17, %v407_v53  ;;  %v456_v2 = vand.u32 2147483647, %v1717_v8  ;;  %v3058_v20 = vmax.f32 %v2993_v45, 0.0 }
  0xb0   : > { %v1987_v40 = vsub.f32 %v3054_v31, %v406_v61  ;;  %v457_v3 = vand.u32 2147483647, %v1723_v12  ;;  %v458_v4 = vand.u32 2147483647, %v1726_v13  ;;  %v459_v5 = vand.u32 2147483647, %v3023_v44 }
  0xb1   : > { %3057 = vst [vmem:[#allocation36_spill] sm:$0xff] %v1994_v9  ;;  %v2001_v61 = vsub.f32 %v3058_v20, %v408_v55  ;;  %v460_v6 = vand.u32 2147483647, %v3026_v51  ;;  %v461_v7 = vand.u32 2147483647, %v3029_v48  ;;  %v3060_v31 = vmax.f32 %v2994_v41, 0.0 }
  0xb2   : > { %3055 = vst [vmem:[#allocation22_spill] sm:$0xff] %v1987_v40  ;;  %v462_v8 = vand.u32 2147483647, %v3032_v42  ;;  %v463_v12 = vand.u32 2147483647, %v3035_v37  ;;  %v3062_v17 = vmax.f32 %v2995_v24, 0.0 }
  0xb3   : > { %3059 = vst [vmem:[#allocation37_spill] sm:$0xff] %v2001_v61  ;;  %v2008_v53 = vsub.f32 %v3060_v31, %v409_v43  ;;  %v464_v13 = vand.u32 2147483647, %v3038_v63  ;;  %v465_v44 = vand.u32 2147483647, %v3041_v50  ;;  %v3064_v20 = vmax.f32 %v2996_v35, 0.0 }
  0xb4   : > { %v2015_v55 = vsub.f32 %v3062_v17, %v410_v59  ;;  %v466_v51 = vand.u32 2147483647, %v2987_v29  ;;  %v467_v48 = vand.u32 2147483647, %v3046_v36  ;;  %v468_v42 = vand.u32 2147483647, %v2989_v22 }
  0xb5   : > { %3061 = vst [vmem:[#allocation38_spill] sm:$0xff] %v2008_v53  ;;  %v2022_v43 = vsub.f32 %v3064_v20, %v411_v33  ;;  %v469_v37 = vand.u32 2147483647, %v2990_v10  ;;  %v470_v63 = vand.u32 2147483647, %v3053_v52  ;;  %v480_v17 = vsub.f32 0.0, %v448_v60 }
  0xb6   : > { %3063 = vst [vmem:[#allocation39_spill] sm:$0xff] %v2015_v55  ;;  %v471_v31 = vand.u32 2147483647, %v2992_v18  ;;  %v472_v59 = vand.u32 2147483647, %v2993_v45  ;;  %v481_v50 = vsub.f32 0.0, %v449_v34 }
  0xb7   : > { %3065 = vst [vmem:[#allocation40_spill] sm:$0xff] %v2022_v43  ;;  %v473_v29 = vand.u32 2147483647, %v2994_v41  ;;  %v474_v36 = vand.u32 2147483647, %v2995_v24  ;;  %v482_v55 = vsub.f32 0.0, %v450_v62 }
  0xb8   : > { %v483_v53 = vsub.f32 0.0, %v451_v28  ;;  %v3066_v33 = vmax.f32 %v2997_v46, 0.0  ;;  %v475_v10 = vand.u32 2147483647, %v2996_v35  ;;  %v476_v52 = vand.u32 2147483647, %v2997_v46 }
  0xb9   : > { %v484_v18 = vsub.f32 0.0, %v452_v54  ;;  %v3068_v45 = vld [vmem:[#allocation29_spill] sm:$0xff]  ;;  %v478_v24 = vand.u32 2147483647, %v2999_v11  ;;  %v485_v62 = vsub.f32 0.0, %v453_v16  ;;  %v3071_v28 = vmax.f32 %v2999_v11, 0.0 }
  0xba   : > { %v2034_v22 = vsub.f32 %v3066_v33, %v1881_v27  ;;  %v3069_v60 = vmax.f32 %v3068_v45, 0.0  ;;  %v477_v41 = vand.u32 2147483647, %v3068_v45  ;;  %v486_v20 = vsub.f32 0.0, %v454_v0  ;;  %v3073_v46 = vld [vmem:[#allocation31_spill] sm:$0xff] }
  0xbb   : > { %v2048_v27 = vsub.f32 %v3071_v28, %v1887_v21  ;;  %v512_v35 = vmul.f32 1.442695, %v480_v17  ;;  %v514_v33 = vmul.f32 1.442695, %v481_v50  ;;  %v3074_v54 = vmax.f32 %v3073_v46, 0.0 }
  0xbc   : > { %3067 = vst [vmem:[#allocation41_spill] sm:$0xff] %v2034_v22  ;;  %v2041_v34 = vsub.f32 %v3069_v60, %v1884_v23  ;;  %v487_v23 = vsub.f32 0.0, %v455_v1  ;;  %v516_v60 = vmul.f32 1.442695, %v482_v55  ;;  %v479_v45 = vand.u32 2147483647, %v3073_v46 }
  0xbd   : > { %3072 = vst [vmem:[#allocation42_spill] sm:$0xff] %v2048_v27  ;;  %v2053_v22 = vsub.f32 %v3074_v54, %v1890_v14  ;;  %v488_v43 = vsub.f32 0.0, %v456_v2  ;;  %1246 = vpow2.f32 %v512_v35  ;;  %v520_v16 = vmul.f32 1.442695, %v484_v18 }
  0xbe   : > { %3070 = vst [vmem:[#allocation29_spill] sm:$0xff] %v2041_v34  ;;  %v518_v34 = vmul.f32 1.442695, %v483_v53  ;;  %v489_v61 = vsub.f32 0.0, %v457_v3  ;;  %v490_v11 = vsub.f32 0.0, %v458_v4  ;;  %1248 = vpow2.f32 %v514_v33 }
  0xbf   : > { %3075 = vst [vmem:[#allocation31_spill] sm:$0xff] %v2053_v22  ;;  %v522_v21 = vmul.f32 1.442695, %v485_v62  ;;  %v491_v0 = vsub.f32 0.0, %v459_v5  ;;  %v492_v17 = vsub.f32 0.0, %v460_v6  ;;  %1250 = vpow2.f32 %v516_v60 }
  0xc0   : > { %v524_v50 = vmul.f32 1.442695, %v486_v20  ;;  %v493_v28 = vsub.f32 0.0, %v461_v7  ;;  %v494_v27 = vsub.f32 0.0, %v462_v8  ;;  %1252 = vpow2.f32 %v518_v34 }
  0xc1   : > { %v526_v14 = vmul.f32 1.442695, %v487_v23  ;;  %v495_v1 = vsub.f32 0.0, %v463_v12  ;;  %v496_v55 = vsub.f32 0.0, %v464_v13  ;;  %1254 = vpow2.f32 %v520_v16 }
  0xc2   : > { %v528_v53 = vmul.f32 1.442695, %v488_v43  ;;  %v497_v46 = vsub.f32 0.0, %v465_v44  ;;  %v498_v2 = vsub.f32 0.0, %v466_v51  ;;  %1256 = vpow2.f32 %v522_v21 }
  0xc3   : > { %v530_v18 = vmul.f32 1.442695, %v489_v61  ;;  %v499_v3 = vsub.f32 0.0, %v467_v48  ;;  %v500_v4 = vsub.f32 0.0, %v468_v42  ;;  %1258 = vpow2.f32 %v524_v50 }
  0xc4   : > { %v532_v62 = vmul.f32 1.442695, %v490_v11  ;;  %v501_v5 = vsub.f32 0.0, %v469_v37  ;;  %v502_v6 = vsub.f32 0.0, %v470_v63  ;;  %1260 = vpow2.f32 %v526_v14 }
  0xc5   : > { %v534_v20 = vmul.f32 1.442695, %v491_v0  ;;  %v503_v7 = vsub.f32 0.0, %v471_v31  ;;  %v504_v8 = vsub.f32 0.0, %v472_v59  ;;  %1262 = vpow2.f32 %v528_v53 }
  0xc6   : > { %v536_v34 = vmul.f32 1.442695, %v492_v17  ;;  %v505_v12 = vsub.f32 0.0, %v473_v29  ;;  %v506_v13 = vsub.f32 0.0, %v474_v36  ;;  %1264 = vpow2.f32 %v530_v18 }
  0xc7   : > { %v538_v43 = vmul.f32 1.442695, %v493_v28  ;;  %v2056_v44 = vpop.eup %1246  ;;  %v507_v51 = vsub.f32 0.0, %v475_v10  ;;  %v508_v61 = vsub.f32 0.0, %v476_v52  ;;  %1266 = vpow2.f32 %v532_v62 }
  0xc8   : > { %v540_v48 = vmul.f32 1.442695, %v494_v27  ;;  %v2058_v42 = vpop.eup %1248  ;;  %v509_v37 = vsub.f32 0.0, %v477_v41  ;;  %v510_v63 = vsub.f32 0.0, %v478_v24  ;;  %1268 = vpow2.f32 %v534_v20 }
  0xc9   : > { %v542_v35 = vmul.f32 1.442695, %v495_v1  ;;  %v2060_v31 = vpop.eup %1250  ;;  %v511_v59 = vsub.f32 0.0, %v479_v45  ;;  %1270 = vpow2.f32 %v536_v34  ;;  %v544_v29 = vmul.f32 1.442695, %v496_v55 }
  0xca   : > { %v546_v36 = vmul.f32 1.442695, %v497_v46  ;;  %v2062_v33 = vpop.eup %1252  ;;  %1272 = vpow2.f32 %v538_v43  ;;  %v548_v54 = vmul.f32 1.442695, %v498_v2  ;;  %v550_v10 = vmul.f32 1.442695, %v499_v3 }
  0xcb   : > { %v552_v52 = vmul.f32 1.442695, %v500_v4  ;;  %v2064_v23 = vpop.eup %1254  ;;  %1274 = vpow2.f32 %v540_v48  ;;  %v554_v27 = vmul.f32 1.442695, %v501_v5  ;;  %v556_v41 = vmul.f32 1.442695, %v502_v6 }
  0xcc   : > { %v579_v24 = vmul.f32 -0.5, %v2056_v44  ;;  %v2067_v60 = vpop.eup %1256  ;;  %1276 = vpow2.f32 %v542_v35  ;;  %v558_v45 = vmul.f32 1.442695, %v503_v7  ;;  %v560_v16 = vmul.f32 1.442695, %v504_v8 }
  0xcd   : > { %v588_v11 = vmul.f32 -0.5, %v2058_v42  ;;  %v2070_v21 = vpop.eup %1258  ;;  %1278 = vpow2.f32 %v544_v29  ;;  %v562_v0 = vmul.f32 1.442695, %v505_v12  ;;  %v564_v17 = vmul.f32 1.442695, %v506_v13 }
  0xce   : > { %v566_v50 = vmul.f32 1.442695, %v507_v51  ;;  %v2072_v28 = vpop.eup %1260  ;;  %1280 = vpow2.f32 %v546_v36  ;;  %v568_v14 = vmul.f32 1.442695, %v508_v61  ;;  %v570_v1 = vmul.f32 1.442695, %v509_v37 }
  0xcf   : > { %v597_v55 = vmul.f32 -0.5, %v2060_v31  ;;  %v2075_v53 = vpop.eup %1262  ;;  %1282 = vpow2.f32 %v548_v54  ;;  %v572_v46 = vmul.f32 1.442695, %v510_v63  ;;  %v574_v2 = vmul.f32 1.442695, %v511_v59 }
  0xd0   : > { %v580_v18 = vadd.f32 1.0, %v579_v24  ;;  %v2077_v3 = vpop.eup %1264  ;;  %1284 = vpow2.f32 %v550_v10  ;;  %v2080_v4 = vadd.f32 1.0, %v2056_v44  ;;  %v589_v62 = vadd.f32 1.0, %v588_v11 }
  0xd1   : > { %v606_v5 = vmul.f32 -0.5, %v2062_v33  ;;  %v2083_v6 = vpop.eup %1266  ;;  %1286 = vpow2.f32 %v552_v52  ;;  %v585_v7 = vadd.f32 1.0, %v2058_v42  ;;  %v615_v8 = vmul.f32 -0.5, %v2064_v23 }
  0xd2   : > { %v2088_v34 = vpop.eup %1268  ;;  %1288 = vpow2.f32 %v554_v27  ;;  %v594_v13 = vadd.f32 1.0, %v2060_v31  ;;  %v598_v43 = vadd.f32 1.0, %v597_v55  ;;  %v2095_v61 = vmul.f32 %v2056_v44, %v580_v18 }
  0xd3   : > { %v2092_v51 = vpop.eup %1270  ;;  %1290 = vpow2.f32 %v556_v41  ;;  %v624_v37 = vmul.f32 -0.5, %v2067_v60  ;;  %v2102_v35 = vmul.f32 %v2058_v42, %v589_v62  ;;  %v603_v59 = vadd.f32 1.0, %v2062_v33 }
  0xd4   : > { %v2099_v63 = vpop.eup %1272  ;;  %1292 = vpow2.f32 %v558_v45  ;;  %v607_v29 = vadd.f32 1.0, %v606_v5  ;;  %v616_v10 = vadd.f32 1.0, %v615_v8  ;;  %v633_v52 = vmul.f32 -0.5, %v2070_v21 }
  0xd5   : > { %v2105_v36 = vpop.eup %1274  ;;  %1294 = vpow2.f32 %v560_v16  ;;  %v2112_v41 = vmul.f32 %v2060_v31, %v598_v43  ;;  %v612_v24 = vadd.f32 1.0, %v2064_v23  ;;  %v642_v45 = vmul.f32 -0.5, %v2072_v28 }
  0xd6   : > { %v2109_v27 = vpop.eup %1276  ;;  %1296 = vpow2.f32 %v562_v0  ;;  %v621_v55 = vadd.f32 1.0, %v2067_v60  ;;  %v625_v18 = vadd.f32 1.0, %v624_v37  ;;  %v2123_v0 = vmul.f32 %v2062_v33, %v607_v29 }
  0xd7   : > { %v2116_v11 = vpop.eup %1278  ;;  %1298 = vpow2.f32 %v564_v17  ;;  %v651_v8 = vmul.f32 -0.5, %v2075_v53  ;;  %v2130_v17 = vmul.f32 %v2064_v23, %v616_v10  ;;  %v630_v16 = vadd.f32 1.0, %v2070_v21 }
  0xd8   : > { %v2120_v62 = vpop.eup %1280  ;;  %1300 = vpow2.f32 %v566_v50  ;;  %v634_v54 = vadd.f32 1.0, %v633_v52  ;;  %v643_v29 = vadd.f32 1.0, %v642_v45  ;;  %v660_v48 = vmul.f32 -0.5, %v2077_v3 }
  0xd9   : > { %v2127_v43 = vpop.eup %1282  ;;  %1302 = vpow2.f32 %v568_v14  ;;  %v2140_v12 = vmul.f32 %v2067_v60, %v625_v18  ;;  %v639_v14 = vadd.f32 1.0, %v2072_v28  ;;  %v669_v10 = vmul.f32 -0.5, %v2083_v6 }
  0xda   : > { %v2133_v37 = vpop.eup %1284  ;;  %1304 = vpow2.f32 %v570_v1  ;;  %v645_v1 = vand.u32 2147483647, %v2072_v28  ;;  %v648_v52 = vadd.f32 1.0, %v2075_v53  ;;  %v652_v45 = vadd.f32 1.0, %v651_v8 }
  0xdb   : > { %v2137_v5 = vpop.eup %1286  ;;  %1306 = vpow2.f32 %v572_v46  ;;  %3076 = vst [vmem:[#allocation43_spill] sm:$0xff] %v2140_v12  ;;  %v2152_v46 = vmul.f32 %v2070_v21, %v634_v54  ;;  %v678_v22 = vmul.f32 -0.5, %v2088_v34  ;;  %v657_v40 = vadd.f32 1.0, %v2077_v3 }
  0xdc   : > { %v2144_v20 = vpop.eup %1288  ;;  %1308 = vpow2.f32 %v574_v2  ;;  %v2159_v2 = vmul.f32 %v2072_v28, %v643_v29  ;;  %v661_v8 = vadd.f32 1.0, %v660_v48  ;;  %v670_v54 = vadd.f32 1.0, %v669_v10 }
  0xdd   : > { %v2148_v50 = vpop.eup %1290  ;;  %1310 = vlog2.f32 %v2080_v4  ;;  %v663_v4 = vand.u32 2147483647, %v2077_v3  ;;  %v687_v39 = vmul.f32 -0.5, %v2092_v51  ;;  %v2169_v25 = vmul.f32 %v2075_v53, %v652_v45 }
  0xde   : > { %v2156_v9 = vpop.eup %1292  ;;  %1312 = vlog2.f32 %v585_v7  ;;  %3077 = vst [vmem:[#allocation44_spill] sm:$0xff] %v2159_v2  ;;  %v666_v28 = vadd.f32 1.0, %v2083_v6  ;;  %v672_v7 = vand.u32 2147483647, %v2083_v6  ;;  %v3079_v48 = vand.u32 2147483647, %v2056_v44 }
  0xdf   : > { %v2162_v19 = vpop.eup %1294  ;;  %1314 = vlog2.f32 %v594_v13  ;;  %3078 = vst [vmem:[#allocation45_spill] sm:$0xff] %v2169_v25  ;;  %v675_v10 = vadd.f32 1.0, %v2088_v34  ;;  %v679_v47 = vadd.f32 1.0, %v678_v22  ;;  %v3082_v30 = vand.u32 2147483647, %v2058_v42 }
  0xe0   : > { %v2166_v18 = vpop.eup %1296  ;;  %1316 = vlog2.f32 %v603_v59  ;;  %vm2177_vm0 = vcmp.lt.f32.partialorder %v3079_v48, 0.0004427343  ;;  %v696_v59 = vmul.f32 -0.5, %v2099_v63  ;;  %v2192_v44 = vmul.f32 %v2077_v3, %v661_v8  ;;  %v3206_v8 = vld [vmem:[#allocation25_spill] sm:$0xff] }
  0xe1   : > { %v2173_v29 = vpop.eup %1298  ;;  %1318 = vlog2.f32 %v612_v24  ;;  %vm2187_vm1 = vcmp.lt.f32.partialorder %v3082_v30, 0.0004427343  ;;  %v681_v48 = vand.u32 2147483647, %v2088_v34  ;;  %v688_v24 = vadd.f32 1.0, %v687_v39 }
  0xe2   : > { %v2183_v45 = vpop.eup %1300  ;;  %1320 = vlog2.f32 %v621_v55  ;;  %v2198_v22 = vmul.f32 %v2083_v6, %v670_v54  ;;  %v684_v57 = vadd.f32 1.0, %v2092_v51  ;;  %v705_v30 = vmul.f32 -0.5, %v2105_v36 }
  0xe3   : > { %v2195_v32 = vpop.eup %1302  ;;  %1322 = vlog2.f32 %v630_v16  ;;  %v3086_v55 = vand.u32 2147483647, %v2060_v31  ;;  %v3087_v3 = vmov 0  ;;  %v3090_v39 = vand.u32 2147483647, %v2062_v33 }
  0xe4   : > { %v2202_v42 = vpop.eup %1304  ;;  %1324 = vlog2.f32 %v639_v14  ;;  %v690_v6 = vand.u32 2147483647, %v2092_v51  ;;  %v693_v16 = vadd.f32 1.0, %v2099_v63  ;;  %v697_v54 = vadd.f32 1.0, %v696_v59 }
  0xe5   : > { %3085 = vst [vmem:[#allocation46_spill] sm:$0xff] %v2202_v42  ;;  %vm2206_vm2 = vcmp.lt.f32.partialorder %v3086_v55, 0.0004427343  ;;  %vm2212_vm3 = vcmp.lt.f32.partialorder %v3090_v39, 0.0004427343  ;;  %v2218_v58 = vpop.eup %1306  ;;  %v3095_v55 = vmov 0  ;;  %1326 = vlog2.f32 %v648_v52 }
  0xe6   : > { %v3088_v3 = vsel %vm2206_vm2, 4294967295, %v3087_v3  ;;  %3093 = vst [vmem:[#allocation48_spill] sm:$0xff] %v2218_v58  ;;  %v3094_v31 = vand.u32 2147483647, %v2064_v23  ;;  %v2227_v33 = vmul.f32 %v2088_v34, %v679_v47  ;;  %v699_v39 = vand.u32 2147483647, %v2099_v63  ;;  %v2231_v15 = vpop.eup %1308 }
  0xe7   : > { %3089 = vst [vmem:[#allocation47_spill] sm:$0xff] %v3088_v3  ;;  %v714_v14 = vmul.f32 -0.5, %v2109_v27  ;;  %3098 = vst [vmem:[#allocation50_spill] sm:$0xff] %v2231_v15  ;;  %v3099_v59 = vand.u32 2147483647, %v2067_v60  ;;  %1328 = vlog2.f32 %v657_v40  ;;  %v2246_v47 = vmul.f32 %v2092_v51, %v688_v24  ;;  %v1311_v56 = vpop.eup %1310 }
  0xe8   : > { %vm2222_vm4 = vcmp.lt.f32.partialorder %v3094_v31, 0.0004427343  ;;  %v3102_v23 = vand.u32 2147483647, %v2070_v21  ;;  %v702_v34 = vadd.f32 1.0, %v2105_v36  ;;  %v706_v52 = vadd.f32 1.0, %v705_v30  ;;  %v1313_v49 = vpop.eup %1312 }
  0xe9   : > { %v3096_v55 = vsel %vm2222_vm4, 4294967295, %v3095_v55  ;;  %vm2235_vm5 = vcmp.lt.f32.partialorder %v3099_v59, 0.0004427343  ;;  %vm2249_vm7 = vcmp.lt.f32.partialorder %v645_v1, 0.0004427343  ;;  %1330 = vlog2.f32 %v666_v28  ;;  %v1315_v24 = vpop.eup %1314 }
  0xea   : > { %3097 = vst [vmem:[#allocation49_spill] sm:$0xff] %v3096_v55  ;;  %vm2241_vm6 = vcmp.lt.f32.partialorder %v3102_v23, 0.0004427343  ;;  %v708_v59 = vand.u32 2147483647, %v2105_v36  ;;  %v715_v21 = vadd.f32 1.0, %v714_v14  ;;  %1332 = vlog2.f32 %v675_v10  ;;  %v1317_v10 = vpop.eup %1316 }
  0xeb   : > { %v723_v23 = vmul.f32 -0.5, %v2116_v11  ;;  %v2255_v15 = vmul.f32 0.6931472, %v1311_v56  ;;  %v2258_v40 = vmul.f32 %v2099_v63, %v697_v54  ;;  %v711_v51 = vadd.f32 1.0, %v2109_v27  ;;  %v3230_v14 = vld [vmem:[#allocation12_spill] sm:$0xff] }
  0xec   : > { %v2261_v1 = vmul.f32 0.6931472, %v1313_v49  ;;  %v3107_v30 = vand.u32 2147483647, %v2075_v53  ;;  %vm2269_vm9 = vcmp.lt.f32.partialorder %v663_v4, 0.0004427343  ;;  %1334 = vlog2.f32 %v684_v57 }
  0xed   : > { %v717_v56 = vand.u32 2147483647, %v2109_v27  ;;  %v720_v63 = vadd.f32 1.0, %v2116_v11  ;;  %vm2275_vm10 = vcmp.lt.f32.partialorder %v672_v7, 0.0004427343  ;;  %v3112_v54 = vmov 0 }
  0xee   : > { %vm2265_vm8 = vcmp.lt.f32.partialorder %v3107_v30, 0.0004427343  ;;  %v3113_v54 = vsel %vm2275_vm10, 4294967295, %v3112_v54  ;;  %1336 = vlog2.f32 %v693_v16  ;;  %v2280_v49 = vmul.f32 %v2105_v36, %v706_v52  ;;  %v1319_v30 = vpop.eup %1318 }
  0xef   : > { %v724_v53 = vadd.f32 1.0, %v723_v23  ;;  %v726_v4 = vand.u32 2147483647, %v2116_v11  ;;  %v2283_v58 = vmul.f32 0.6931472, %v1315_v24  ;;  %1338 = vlog2.f32 %v702_v34  ;;  %v1321_v7 = vpop.eup %1320 }
  0xf0   : > { %v2285_v57 = vmul.f32 0.6931472, %v1317_v10  ;;  %v2288_v42 = vmul.f32 %v2109_v27, %v715_v21  ;;  %v2294_v36 = vmul.f32 0.6931472, %v1319_v30  ;;  %vm2296_vm11 = vcmp.lt.f32.partialorder %v681_v48, 0.0004427343  ;;  %v1323_v24 = vpop.eup %1322 }
  0xf1   : > { %v3116_v52 = vmov 0  ;;  %1340 = vlog2.f32 %v711_v51  ;;  %v729_v23 = vadd.f32 1.0, %v2120_v62  ;;  %v2305_v34 = vmul.f32 0.6931472, %v1321_v7  ;;  %v1325_v10 = vpop.eup %1324 }
  0xf2   : > { %3114 = vst [vmem:[#allocation51_spill] sm:$0xff] %v2285_v57  ;;  %3115 = vst [vmem:[#allocation52_spill] sm:$0xff] %v2294_v36  ;;  %v3117_v52 = vsel %vm2296_vm11, 4294967295, %v3116_v52  ;;  %vm2307_vm12 = vcmp.lt.f32.partialorder %v690_v6, 0.0004427343  ;;  %v3121_v48 = vmov 0  ;;  %1342 = vlog2.f32 %v720_v63 }
  0xf3   : > { %3118 = vst [vmem:[#allocation53_spill] sm:$0xff] %v2305_v34  ;;  %vm2311_vm13 = vcmp.lt.f32.partialorder %v699_v39, 0.0004427343  ;;  %v732_v51 = vmul.f32 -0.5, %v2120_v62  ;;  %v2316_v30 = vmul.f32 0.6931472, %v1323_v24  ;;  %v2323_v7 = vmul.f32 %v2116_v11, %v724_v53  ;;  %v1327_v39 = vpop.eup %1326 }
  0xf4   : > { %v3122_v48 = vsel %vm2311_vm13, 4294967295, %v3121_v48  ;;  %vm2318_vm14 = vcmp.lt.f32.partialorder %v708_v59, 0.0004427343  ;;  %v3124_v16 = vmov 0  ;;  %1344 = vlog2.f32 %v729_v23  ;;  %v1329_v11 = vpop.eup %1328 }
  0xf5   : > { %3123 = vst [vmem:[#allocation54_spill] sm:$0xff] %v2316_v30  ;;  %v3125_v16 = vsel %vm2318_vm14, 4294967295, %v3124_v16  ;;  %3126 = vst [vmem:[#allocation55_spill] sm:$0xff] %v2323_v7  ;;  %v735_v6 = vand.u32 2147483647, %v2120_v62  ;;  %v738_v27 = vadd.f32 1.0, %v2127_v43  ;;  %v1331_v57 = vpop.eup %1330 }
  0xf6   : > { %v2334_v24 = vmul.f32 0.6931472, %v1325_v10  ;;  %v2341_v23 = vmul.f32 0.6931472, %v1327_v39  ;;  %vm2343_vm15 = vcmp.lt.f32.partialorder %v717_v56, 0.0004427343 }
  0xf7   : > { %v3129_v3 = vmov 0  ;;  %vm2347_vm2 = vcmp.lt.f32.partialorder %v726_v4, 0.0004427343  ;;  %v3131_v63 = vmov 0  ;;  %v733_v10 = vadd.f32 1.0, %v732_v51  ;;  %v1333_v4 = vpop.eup %1332 }
  0xf8   : > { %3127 = vst [vmem:[#allocation56_spill] sm:$0xff] %v2334_v24  ;;  %3128 = vst [vmem:[#allocation57_spill] sm:$0xff] %v2341_v23  ;;  %v3130_v3 = vsel %vm2343_vm15, 4294967295, %v3129_v3  ;;  %v3132_v63 = vsel %vm2347_vm2, 4294967295, %v3131_v63  ;;  %v741_v59 = vmul.f32 -0.5, %v2127_v43  ;;  %1346 = vlog2.f32 %v738_v27  ;;  %v1335_v34 = vpop.eup %1334 }
  0xf9   : > { %3133 = vst [vmem:[#allocation58_spill] sm:$0xff] %v3132_v63  ;;  %v2360_v39 = vmul.f32 0.6931472, %v1329_v11  ;;  %v2366_v53 = vmul.f32 0.6931472, %v1331_v57  ;;  %v3134_v36 = vmov 0  ;;  %v1337_v30 = vpop.eup %1336 }
  0xfa   : > { %vm2368_vm4 = vcmp.lt.f32.partialorder %v735_v6, 0.0004427343  ;;  %v742_v55 = vadd.f32 1.0, %v741_v59  ;;  %v2372_v12 = vmul.f32 0.6931472, %v1333_v4  ;;  %v747_v27 = vadd.f32 1.0, %v2133_v37  ;;  %v1339_v51 = vpop.eup %1338 }
  0xfb   : > { %v3135_v36 = vsel %vm2368_vm4, 4294967295, %v3134_v36  ;;  %v744_v11 = vand.u32 2147483647, %v2127_v43  ;;  %v750_v56 = vmul.f32 -0.5, %v2133_v37  ;;  %v2385_v59 = vmul.f32 0.6931472, %v1335_v34  ;;  %v1341_v23 = vpop.eup %1340 }
  0xfc   : > { %3136 = vst [vmem:[#allocation59_spill] sm:$0xff] %v3135_v36  ;;  %3137 = vst [vmem:[#allocation60_spill] sm:$0xff] %v2372_v12  ;;  %v2388_v4 = vmul.f32 %v2120_v62, %v733_v10  ;;  %v2394_v2 = vmul.f32 0.6931472, %v1337_v30  ;;  %1348 = vlog2.f32 %v747_v27  ;;  %v2396_v25 = vmul.f32 0.6931472, %v1339_v51  ;;  %v1343_v10 = vpop.eup %1342 }
  0xfd   : > { %3138 = vst [vmem:[#allocation61_spill] sm:$0xff] %v2385_v59  ;;  %v751_v57 = vadd.f32 1.0, %v750_v56  ;;  %v2399_v6 = vmul.f32 %v2127_v43, %v742_v55  ;;  %v753_v34 = vand.u32 2147483647, %v2133_v37  ;;  %v756_v62 = vadd.f32 1.0, %v2137_v5 }
  0xfe   : > { %3139 = vst [vmem:[#allocation62_spill] sm:$0xff] %v2388_v4  ;;  %3140 = vst [vmem:[#allocation63_spill] sm:$0xff] %v2394_v2  ;;  %v2407_v30 = vmul.f32 0.6931472, %v1341_v23  ;;  %vm2409_vm10 = vcmp.lt.f32.partialorder %v744_v11, 0.0004427343  ;;  %v1345_v43 = vpop.eup %1344 }
  0xff   : > { %3141 = vst [vmem:[#allocation64_spill] sm:$0xff] %v2396_v25  ;;  %3142 = vst [vmem:[#allocation65_spill] sm:$0xff] %v2399_v6  ;;  %v3144_v56 = vmov 0  ;;  %v759_v51 = vmul.f32 -0.5, %v2137_v5  ;;  %v2422_v24 = vmul.f32 0.6931472, %v1343_v10  ;;  %1350 = vlog2.f32 %v756_v62 }
 0x100   : > { %3143 = vst [vmem:[#allocation66_spill] sm:$0xff] %v2407_v30  ;;  %v3145_v56 = vsel %vm2409_vm10, 4294967295, %v3144_v56  ;;  %v2428_v11 = vmul.f32 0.6931472, %v1345_v43  ;;  %v2431_v12 = vmul.f32 %v2133_v37, %v751_v57  ;;  %vm2433_vm11 = vcmp.lt.f32.partialorder %v753_v34, 0.0004427343 }
 0x101   : > { %3146 = vst [vmem:[#allocation67_spill] sm:$0xff] %v2422_v24  ;;  %v3149_v55 = vmov 0  ;;  %v760_v59 = vadd.f32 1.0, %v759_v51  ;;  %v762_v27 = vand.u32 2147483647, %v2137_v5  ;;  %v765_v10 = vadd.f32 1.0, %v2144_v20 }
 0x102   : > { %3147 = vst [vmem:[#allocation68_spill] sm:$0xff] %v2428_v11  ;;  %3148 = vst [vmem:[#allocation69_spill] sm:$0xff] %v2431_v12  ;;  %v3150_v55 = vsel %vm2433_vm11, 4294967295, %v3149_v55  ;;  %v768_v62 = vmul.f32 -0.5, %v2144_v20  ;;  %v1347_v2 = vpop.eup %1346  ;;  %v771_v57 = vand.u32 2147483647, %v2144_v20 }
 0x103   : > { %3151 = vst [vmem:[#allocation70_spill] sm:$0xff] %v3150_v55  ;;  %v774_v34 = vadd.f32 1.0, %v2148_v50  ;;  %v2454_v23 = vmul.f32 0.6931472, %v1347_v2  ;;  %1352 = vlog2.f32 %v765_v10  ;;  %v777_v43 = vmul.f32 -0.5, %v2148_v50 }
 0x104   : > { %v769_v25 = vadd.f32 1.0, %v768_v62  ;;  %v780_v30 = vand.u32 2147483647, %v2148_v50  ;;  %v783_v37 = vadd.f32 1.0, %v2156_v9  ;;  %v2460_v24 = vmul.f32 %v2137_v5, %v760_v59 }
 0x105   : > { %3152 = vst [vmem:[#allocation71_spill] sm:$0xff] %v2454_v23  ;;  %1354 = vlog2.f32 %v774_v34  ;;  %vm2462_vm2 = vcmp.lt.f32.partialorder %v762_v27, 0.0004427343  ;;  %v3154_v7 = vmov 0  ;;  %v786_v51 = vmul.f32 -0.5, %v2156_v9 }
 0x106   : > { %3153 = vst [vmem:[#allocation72_spill] sm:$0xff] %v2460_v24  ;;  %v3155_v7 = vsel %vm2462_vm2, 4294967295, %v3154_v7  ;;  %v789_v2 = vand.u32 2147483647, %v2156_v9  ;;  %v1349_v10 = vpop.eup %1348  ;;  %vm2472_vm4 = vcmp.lt.f32.partialorder %v771_v57, 0.0004427343  ;;  %1356 = vlog2.f32 %v783_v37 }
 0x107   : > { %3156 = vst [vmem:[#allocation73_spill] sm:$0xff] %v3155_v7  ;;  %v3157_v34 = vmov 0  ;;  %v778_v5 = vadd.f32 1.0, %v777_v43  ;;  %v792_v59 = vadd.f32 1.0, %v2162_v19  ;;  %v2477_v27 = vmul.f32 0.6931472, %v1349_v10 }
 0x108   : > { %v3158_v34 = vsel %vm2472_vm4, 4294967295, %v3157_v34  ;;  %v2480_v11 = vmul.f32 %v2144_v20, %v769_v25  ;;  %v787_v4 = vadd.f32 1.0, %v786_v51  ;;  %v795_v36 = vmul.f32 -0.5, %v2162_v19  ;;  %v3239_v21 = vld [vmem:[#allocation64_spill] sm:$0xff] }
 0x109   : > { %3159 = vst [vmem:[#allocation74_spill] sm:$0xff] %v3158_v34  ;;  %3160 = vst [vmem:[#allocation75_spill] sm:$0xff] %v2477_v27  ;;  %vm2483_vm15 = vcmp.lt.f32.partialorder %v780_v30, 0.0004427343  ;;  %v3162_v63 = vmov 0  ;;  %1358 = vlog2.f32 %v792_v59  ;;  %v801_v43 = vadd.f32 1.0, %v2166_v18  ;;  %v1351_v37 = vpop.eup %1350 }
 0x10a   : > { %3161 = vst [vmem:[#allocation76_spill] sm:$0xff] %v2480_v11  ;;  %v3163_v63 = vsel %vm2483_vm15, 4294967295, %v3162_v63  ;;  %v798_v57 = vand.u32 2147483647, %v2162_v19  ;;  %v2490_v62 = vmul.f32 %v2148_v50, %v778_v5  ;;  %vm2492_vm10 = vcmp.lt.f32.partialorder %v789_v2, 0.0004427343 }
 0x10b   : > { %3164 = vst [vmem:[#allocation77_spill] sm:$0xff] %v3163_v63  ;;  %v796_v25 = vadd.f32 1.0, %v795_v36  ;;  %v804_v20 = vmul.f32 -0.5, %v2166_v18  ;;  %v2501_v51 = vmul.f32 0.6931472, %v1351_v37  ;;  %1360 = vlog2.f32 %v801_v43 }
 0x10c   : > { %3165 = vst [vmem:[#allocation78_spill] sm:$0xff] %v2490_v62  ;;  %v807_v59 = vand.u32 2147483647, %v2166_v18  ;;  %v2505_v50 = vmul.f32 %v2156_v9, %v787_v4  ;;  %v810_v5 = vadd.f32 1.0, %v2173_v29  ;;  %v813_v36 = vmul.f32 -0.5, %v2173_v29 }
 0x10d   : > { %3168 = vst [vmem:[#allocation79_spill] sm:$0xff] %v2501_v51  ;;  %v805_v2 = vadd.f32 1.0, %v804_v20  ;;  %v2510_v23 = vmul.f32 %v2162_v19, %v796_v25  ;;  %vm2512_vm14 = vcmp.lt.f32.partialorder %v798_v57, 0.0004427343  ;;  %v816_v37 = vand.u32 2147483647, %v2173_v29  ;;  %v1353_v30 = vpop.eup %1352 }
 0x10e   : > { %v819_v43 = vadd.f32 1.0, %v2183_v45  ;;  %1362 = vlog2.f32 %v810_v5  ;;  %v814_v4 = vadd.f32 1.0, %v813_v36  ;;  %v822_v20 = vmul.f32 -0.5, %v2183_v45  ;;  %v3194_v57 = vld [vmem:[#allocation21_spill] sm:$0xff] }
 0x10f   : > { %v1355_v19 = vpop.eup %1354  ;;  %v2523_v25 = vmul.f32 0.6931472, %v1353_v30  ;;  %vm2525_vm11 = vcmp.lt.f32.partialorder %v807_v59, 0.0004427343  ;;  %v825_v27 = vand.u32 2147483647, %v2183_v45  ;;  %v2533_v55 = vmul.f32 %v2166_v18, %v805_v2 }
 0x110   : > { %1364 = vlog2.f32 %v819_v43  ;;  %v2530_v12 = vmul.f32 0.6931472, %v1355_v19  ;;  %v823_v9 = vadd.f32 1.0, %v822_v20  ;;  %v828_v5 = vadd.f32 1.0, %v2195_v32  ;;  %v1357_v36 = vpop.eup %1356  ;;  %v3179_v19 = vld [vmem:[#allocation46_spill] sm:$0xff]  ;;  %v3182_v18 = vld [vmem:[#allocation48_spill] sm:$0xff] }
 0x111   : > { %3171 = vst [vmem:[#allocation80_spill] sm:$0xff] %v2523_v25  ;;  %v2537_v51 = vmul.f32 %v2173_v29, %v814_v4  ;;  %vm2539_vm2 = vcmp.lt.f32.partialorder %v816_v37, 0.0004427343  ;;  %v831_v59 = vmul.f32 -0.5, %v2195_v32  ;;  %v834_v43 = vand.u32 2147483647, %v2195_v32 }
 0x112   : > { %3174 = vst [vmem:[#allocation81_spill] sm:$0xff] %v2530_v12  ;;  %v2549_v2 = vmul.f32 0.6931472, %v1357_v36  ;;  %vm2551_vm13 = vcmp.lt.f32.partialorder %v825_v27, 0.0004427343  ;;  %1366 = vlog2.f32 %v828_v5  ;;  %v837_v24 = vadd.f32 1.0, %v3179_v19 }
 0x113   : > { %v1359_v29 = vpop.eup %1358  ;;  %v832_v4 = vadd.f32 1.0, %v831_v59  ;;  %v840_v7 = vmul.f32 -0.5, %v3179_v19  ;;  %v2564_v36 = vmul.f32 %v2183_v45, %v823_v9  ;;  %vm2566_vm4 = vcmp.lt.f32.partialorder %v834_v43, 0.0004427343  ;;  %v3249_v27 = vld [vmem:[#allocation67_spill] sm:$0xff] }
 0x114   : > { %v2561_v34 = vmul.f32 0.6931472, %v1359_v29  ;;  %v843_v5 = vand.u32 2147483647, %v3179_v19  ;;  %v846_v25 = vadd.f32 1.0, %v3182_v18  ;;  %v791_v59 = vsel %vm2492_vm10, %v2505_v50, %v2549_v2 }
 0x115   : > { %v1361_v63 = vpop.eup %1360  ;;  %1368 = vlog2.f32 %v837_v24  ;;  %v841_v29 = vadd.f32 1.0, %v840_v7  ;;  %v849_v37 = vmul.f32 -0.5, %v3182_v18  ;;  %v833_v43 = vmul.f32 %v2195_v32, %v832_v4  ;;  %v3185_v24 = vld [vmem:[#allocation50_spill] sm:$0xff] }
 0x116   : > { %v800_v45 = vsel %vm2512_vm14, %v2510_v23, %v2561_v34  ;;  %v803_v9 = vmul.f32 0.6931472, %v1361_v63  ;;  %1370 = vlog2.f32 %v846_v25  ;;  %vm2582_vm15 = vcmp.lt.f32.partialorder %v843_v5, 0.0004427343  ;;  %v3186_v63 = vld [vmem:[#allocation18_spill] sm:$0xff] }
 0x117   : > { %v850_v62 = vadd.f32 1.0, %v849_v37  ;;  %v852_v10 = vand.u32 2147483647, %v3182_v18  ;;  %v855_v7 = vadd.f32 1.0, %v3185_v24  ;;  %v842_v2 = vmul.f32 %v3179_v19, %v841_v29  ;;  %v3190_v29 = vld [vmem:[#allocation20_spill] sm:$0xff] }
 0x118   : > { %v1363_v50 = vpop.eup %1362  ;;  %v858_v11 = vmul.f32 -0.5, %v3185_v24  ;;  %v861_v6 = vand.u32 2147483647, %v3185_v24  ;;  %v3187_v32 = vsel %vm2177_vm0, %v2095_v61, %v2255_v15  ;;  %v809_v25 = vsel %vm2525_vm11, %v2533_v55, %v803_v9  ;;  %v3198_v9 = vld [vmem:[#allocation23_spill] sm:$0xff] }
 0x119   : > { %v2597_v23 = vadd.f32 %v3187_v32, %v3186_v63  ;;  %v812_v37 = vmul.f32 0.6931472, %v1363_v50  ;;  %v851_v4 = vmul.f32 %v3182_v18, %v850_v62  ;;  %1372 = vlog2.f32 %v855_v7  ;;  %v3195_v18 = vld [vmem:[#allocation47_spill] sm:$0xff]  ;;  %v3204_v7 = vld [vmem:[#allocation52_spill] sm:$0xff]  ;;  %v3208_v32 = vld [vmem:[#allocation53_spill] sm:$0xff] }
 0x11a   : > { %v1365_v34 = vpop.eup %1364  ;;  %vm2603_vm10 = vcmp.lt.f32.partialorder %v852_v10, 0.0004427343  ;;  %v859_v13 = vadd.f32 1.0, %v858_v11  ;;  %v3191_v15 = vsel %vm2187_vm1, %v2102_v35, %v2261_v1  ;;  %vm2618_vm0 = vcmp.lt.f32.partialorder %v861_v6, 0.0004427343  ;;  %v3199_v35 = vld [vmem:[#allocation51_spill] sm:$0xff] }
 0x11b   : > { %v821_v19 = vmul.f32 0.6931472, %v1365_v34  ;;  %v2613_v61 = vadd.f32 %v3191_v15, %v3190_v29  ;;  %v818_v55 = vsel %vm2539_vm2, %v2537_v51, %v812_v37  ;;  %vm3196_vm11 = vnez %v3195_v18  ;;  %v3201_v51 = vld [vmem:[#allocation24_spill] sm:$0xff]  ;;  %v3202_v10 = vld [vmem:[#allocation49_spill] sm:$0xff]  ;;  %v3210_v29 = vld [vmem:[#allocation26_spill] sm:$0xff] }
 0x11c   : > { %v3197_v11 = vsel %vm3196_vm11, %v2112_v41, %v2283_v58  ;;  %v3200_v1 = vsel %vm2212_vm3, %v2123_v0, %v3199_v35  ;;  %vm3203_vm1 = vnez %v3202_v10  ;;  %v1367_v63 = vpop.eup %1366  ;;  %v860_v41 = vmul.f32 %v3185_v24, %v859_v13  ;;  %v3207_v0 = vld [vmem:[#allocation43_spill] sm:$0xff]  ;;  %v3214_v24 = vld [vmem:[#allocation44_spill] sm:$0xff] }
 0x11d   : > { %v2628_v26 = vadd.f32 %v3197_v11, %v3194_v57  ;;  %v2636_v30 = vadd.f32 %v3200_v1, %v3198_v9  ;;  %v3205_v50 = vsel %vm3203_vm1, %v2130_v17, %v3204_v7  ;;  %v827_v58 = vsel %vm2551_vm13, %v2564_v36, %v821_v19  ;;  %v3211_v17 = vld [vmem:[#allocation54_spill] sm:$0xff]  ;;  %v3213_v36 = vld [vmem:[#allocation27_spill] sm:$0xff]  ;;  %v3215_v19 = vld [vmem:[#allocation56_spill] sm:$0xff] }
 0x11e   : > { %v2644_v6 = vadd.f32 %v3205_v50, %v3201_v51  ;;  %v3209_v34 = vsel %vm2235_vm5, %v3207_v0, %v3208_v32  ;;  %v3212_v15 = vsel %vm2241_vm6, %v2152_v46, %v3211_v17  ;;  %v830_v20 = vmul.f32 0.6931472, %v1367_v63  ;;  %v3217_v18 = vld [vmem:[#allocation28_spill] sm:$0xff]  ;;  %v3218_v11 = vld [vmem:[#allocation45_spill] sm:$0xff]  ;;  %v3221_v46 = vld [vmem:[#allocation30_spill] sm:$0xff] }
 0x11f   : > { %v2656_v37 = vadd.f32 %v3209_v34, %v3206_v8  ;;  %v2664_v57 = vadd.f32 %v3212_v15, %v3210_v29  ;;  %v3216_v38 = vsel %vm2249_vm7, %v3214_v24, %v3215_v19  ;;  %v3219_v9 = vld [vmem:[#allocation57_spill] sm:$0xff]  ;;  %v3222_v1 = vsel %vm2269_vm9, %v2192_v44, %v2360_v39  ;;  %v3223_v51 = vld [vmem:[#allocation32_spill] sm:$0xff]  ;;  %v3226_v7 = vld [vmem:[#allocation11_spill] sm:$0xff]  ;;  %v1369_v34 = vpop.eup %1368 }
 0x120   : > { %v2672_v13 = vadd.f32 %v3216_v38, %v3213_v36  ;;  %v3220_v31 = vsel %vm2265_vm8, %v3218_v11, %v3219_v9  ;;  %v2688_v60 = vadd.f32 %v3222_v1, %v3221_v46  ;;  %vm3224_vm2 = vnez %v3113_v54  ;;  %v3228_v50 = vld [vmem:[#allocation60_spill] sm:$0xff]  ;;  %v3231_v44 = vld [vmem:[#allocation61_spill] sm:$0xff]  ;;  %v3246_v24 = vld [vmem:[#allocation58_spill] sm:$0xff]  ;;  %v1371_v38 = vpop.eup %1370 }
 0x121   : > { %v2680_v35 = vadd.f32 %v3220_v31, %v3217_v18  ;;  %v3225_v10 = vsel %vm3224_vm2, %v2198_v22, %v2366_v53  ;;  %vm3227_vm3 = vnez %v3117_v52  ;;  %v3232_v39 = vsel %vm2307_vm12, %v2246_v47, %v3231_v44  ;;  %v3233_v32 = vld [vmem:[#allocation13_spill] sm:$0xff]  ;;  %v3235_v22 = vld [vmem:[#allocation63_spill] sm:$0xff]  ;;  %v3255_v9 = vld [vmem:[#allocation68_spill] sm:$0xff] }
 0x122   : > { %v874_v28 = vadd.f32 %v3225_v10, %v3223_v51  ;;  %v3229_v63 = vsel %vm3227_vm3, %v2227_v33, %v3228_v50  ;;  %v876_v0 = vadd.f32 %v3232_v39, %v3230_v14  ;;  %vm3234_vm5 = vnez %v3122_v48  ;;  %v3237_v33 = vld [vmem:[#allocation14_spill] sm:$0xff]  ;;  %v3241_v47 = vld [vmem:[#allocation15_spill] sm:$0xff]  ;;  %v3251_v18 = vld [vmem:[#allocation17_spill] sm:$0xff] }
 0x123   : > { %v875_v8 = vadd.f32 %v3229_v63, %v3226_v7  ;;  %v3236_v54 = vsel %vm3234_vm5, %v2258_v40, %v3235_v22  ;;  %v836_v52 = vsel %vm2566_vm4, %v833_v43, %v830_v20  ;;  %vm3238_vm6 = vnez %v3125_v16  ;;  %v3243_v48 = vld [vmem:[#allocation66_spill] sm:$0xff]  ;;  %v3245_v40 = vld [vmem:[#allocation16_spill] sm:$0xff]  ;;  %v3248_v19 = vld [vmem:[#allocation55_spill] sm:$0xff] }
 0x124   : > { %v877_v53 = vadd.f32 %v3236_v54, %v3233_v32  ;;  %v3240_v29 = vsel %vm3238_vm6, %v2280_v49, %v3239_v21  ;;  %vm3242_vm7 = vnez %v3130_v3  ;;  %vm3247_vm8 = vnez %v3246_v24  ;;  %v3252_v11 = vld [vmem:[#allocation59_spill] sm:$0xff]  ;;  %v3254_v49 = vld [vmem:[#allocation62_spill] sm:$0xff]  ;;  %v3257_v46 = vld [vmem:[#allocation33_spill] sm:$0xff] }
 0x125   : > { %v878_v17 = vadd.f32 %v3240_v29, %v3237_v33  ;;  %v3244_v15 = vsel %vm3242_vm7, %v2288_v42, %v3243_v48  ;;  %v3250_v43 = vsel %vm3247_vm8, %v3248_v19, %v3249_v27  ;;  %v839_v16 = vmul.f32 0.6931472, %v1369_v34  ;;  %v3259_v42 = vld [vmem:[#allocation65_spill] sm:$0xff]  ;;  %v3260_v1 = vld [vmem:[#allocation71_spill] sm:$0xff]  ;;  %v3263_v50 = vld [vmem:[#allocation70_spill] sm:$0xff] }
 0x126   : > { %v879_v36 = vadd.f32 %v3244_v15, %v3241_v47  ;;  %v880_v20 = vadd.f32 %v3250_v43, %v3245_v40  ;;  %vm3253_vm4 = vnez %v3252_v11  ;;  %vm3258_vm9 = vnez %v3145_v56  ;;  %v3262_v7 = vld [vmem:[#allocation19_spill] sm:$0xff]  ;;  %v3265_v63 = vld [vmem:[#allocation69_spill] sm:$0xff]  ;;  %v3268_v22 = vld [vmem:[#allocation34_spill] sm:$0xff] }
 0x127   : > { %v3256_v31 = vsel %vm3253_vm4, %v3254_v49, %v3255_v9  ;;  %v3261_v51 = vsel %vm3258_vm9, %v3259_v42, %v3260_v1  ;;  %vm3264_vm12 = vnez %v3263_v50  ;;  %v3266_v14 = vld [vmem:[#allocation75_spill] sm:$0xff]  ;;  %v848_v32 = vmul.f32 0.6931472, %v1371_v38  ;;  %v3269_v54 = vld [vmem:[#allocation73_spill] sm:$0xff]  ;;  %v3271_v34 = vld [vmem:[#allocation72_spill] sm:$0xff] }
 0x128   : > { %v881_v3 = vadd.f32 %v3256_v31, %v3251_v18  ;;  %v882_v10 = vadd.f32 %v3261_v51, %v3257_v46  ;;  %v3267_v44 = vsel %vm3264_vm12, %v3265_v63, %v3266_v14  ;;  %vm3270_vm13 = vnez %v3269_v54  ;;  %v3272_v33 = vld [vmem:[#allocation79_spill] sm:$0xff]  ;;  %v3275_v47 = vld [vmem:[#allocation74_spill] sm:$0xff]  ;;  %v3277_v48 = vld [vmem:[#allocation76_spill] sm:$0xff] }
 0x129   : > { %v883_v39 = vadd.f32 %v3267_v44, %v3262_v7  ;;  %v3273_v21 = vsel %vm3270_vm13, %v3271_v34, %v3272_v33  ;;  %v3274_v56 = vld [vmem:[#allocation35_spill] sm:$0xff]  ;;  %vm3276_vm14 = vnez %v3275_v47  ;;  %v3278_v15 = vld [vmem:[#allocation80_spill] sm:$0xff]  ;;  %v3280_v19 = vld [vmem:[#allocation22_spill] sm:$0xff]  ;;  %v845_v49 = vsel %vm2582_vm15, %v842_v2, %v839_v16  ;;  %v1373_v7 = vpop.eup %1372  ;;  %899 = sbr.rel (%p3295_p6) target bundleno = 363 (0x16b), region = 40 }
 0x12a   : > { %v884_v29 = vadd.f32 %v3273_v21, %v3268_v22  ;;  %v3279_v40 = vsel %vm3276_vm14, %v3277_v48, %v3278_v15  ;;  %v3281_v27 = vld [vmem:[#allocation77_spill] sm:$0xff]  ;;  %v3283_v43 = vld [vmem:[#allocation78_spill] sm:$0xff]  ;;  %v3286_v9 = vld [vmem:[#allocation36_spill] sm:$0xff]  ;;  %v854_v50 = vsel %vm2603_vm10, %v851_v4, %v848_v32  ;;  %v857_v33 = vmul.f32 0.6931472, %v1373_v7 }
 0x12b   : > { %v885_v24 = vadd.f32 %v3279_v40, %v3274_v56  ;;  %vm3282_vm11 = vnez %v3281_v27  ;;  %v3284_v18 = vld [vmem:[#allocation81_spill] sm:$0xff]  ;;  %v887_v31 = vadd.f32 %v791_v59, %v3286_v9  ;;  %v3288_v1 = vld [vmem:[#allocation38_spill] sm:$0xff]  ;;  %v3289_v63 = vld [vmem:[#allocation39_spill] sm:$0xff]  ;;  %v900_v4 = vadd.f32 (!%p3295_p6), %v2613_v61, %v2597_v23 }
 0x12c   : > { %v3285_v38 = vsel %vm3282_vm11, %v3283_v43, %v3284_v18  ;;  %v3287_v46 = vld [vmem:[#allocation37_spill] sm:$0xff]  ;;  %v889_v51 = vadd.f32 %v809_v25, %v3288_v1  ;;  %v890_v14 = vadd.f32 %v818_v55, %v3289_v63  ;;  %v3290_v44 = vld [vmem:[#allocation40_spill] sm:$0xff]  ;;  %v3293_v2 = vld [vmem:[#allocation42_spill] sm:$0xff]  ;;  %v863_v59 = vsel %vm2618_vm0, %v860_v41, %v857_v33 }
 0x12d   : > { %v886_v11 = vadd.f32 %v3285_v38, %v3280_v19  ;;  %v888_v42 = vadd.f32 %v800_v45, %v3287_v46  ;;  %v891_v22 = vadd.f32 %v827_v58, %v3290_v44  ;;  %v3291_v54 = vld [vmem:[#allocation41_spill] sm:$0xff]  ;;  %v894_v16 = vadd.f32 %v854_v50, %v3293_v2  ;;  %v3294_v45 = vld [vmem:[#allocation31_spill] sm:$0xff] }
 0x12e   : > { %v892_v34 = vadd.f32 %v836_v52, %v3291_v54  ;;  %v3292_v21 = vld [vmem:[#allocation29_spill] sm:$0xff]  ;;  %v895_v25 = vadd.f32 %v863_v59, %v3294_v45  ;;  %v901_v5 = vadd.f32 (!%p3295_p6), %v900_v4, %v2628_v26 }
 0x12f   : > { %v893_v12 = vadd.f32 %v845_v49, %v3292_v21 }
 0x130   : > { %v902_v55 = vadd.f32 %v901_v5, %v2636_v30 }
 0x132   : > { %v903_v58 = vadd.f32 %v902_v55, %v2644_v6 }
 0x134   : > { %v904_v62 = vadd.f32 %v903_v58, %v2656_v37 }
 0x136   : > { %v905_v41 = vadd.f32 %v904_v62, %v2664_v57 }
 0x138   : > { %v906_v52 = vadd.f32 %v905_v41, %v2672_v13 }
 0x13a   : > { %v907_v32 = vadd.f32 %v906_v52, %v2680_v35 }
 0x13c   : > { %v908_v56 = vadd.f32 %v907_v32, %v2688_v60 }
 0x13e   : > { %v909_v47 = vadd.f32 %v908_v56, %v874_v28 }
 0x140   : > { %v910_v48 = vadd.f32 %v909_v47, %v875_v8 }
 0x142   : > { %v911_v15 = vadd.f32 %v910_v48, %v876_v0 }
 0x144   : > { %v912_v40 = vadd.f32 %v911_v15, %v877_v53 }
 0x146   : > { %v913_v19 = vadd.f32 %v912_v40, %v878_v17 }
 0x148   : > { %v914_v27 = vadd.f32 %v913_v19, %v879_v36 }
 0x14a   : > { %v915_v43 = vadd.f32 %v914_v27, %v880_v20 }
 0x14c   : > { %v916_v18 = vadd.f32 %v915_v43, %v881_v3 }
 0x14e   : > { %v917_v38 = vadd.f32 %v916_v18, %v882_v10 }
 0x150   : > { %v918_v49 = vadd.f32 %v917_v38, %v883_v39 }
 0x152   : > { %v919_v9 = vadd.f32 %v918_v49, %v884_v29 }
 0x154   : > { %v920_v46 = vadd.f32 %v919_v9, %v885_v24 }
 0x156   : > { %v921_v1 = vadd.f32 %v920_v46, %v886_v11 }
 0x158   : > { %v922_v7 = vadd.f32 %v921_v1, %v887_v31 }
 0x15a   : > { %v923_v50 = vadd.f32 %v922_v7, %v888_v42 }
 0x15c   : > { %v924_v63 = vadd.f32 %v923_v50, %v889_v51 }
 0x15e   : > { %v925_v44 = vadd.f32 %v924_v63, %v890_v14 }
 0x160   : > { %v926_v54 = vadd.f32 %v925_v44, %v891_v22 }
 0x162   : > { %v927_v33 = vadd.f32 %v926_v54, %v892_v34 }
 0x164   : > { %v928_v28 = vadd.f32 %v927_v33, %v893_v12 }
 0x166   : > { %v929_v8 = vadd.f32 %v928_v28, %v894_v16 }
 0x168   : > { %v930_v0 = vadd.f32 %v929_v8, %v895_v25 }
 0x16a   : > { %931 = vst [vmem:[%s2787_s20] sm:$0xff] %v930_v0 }
 0x16b PF: > { %p1194_p5 = scmp.ne.s32.totalorder %s1545_s13, 2 }
 0x16c   : > { %v936_v53 = vlaneseq (!%p1194_p5)  ;;  %v1033_v17 = vadd.f32 (!%p1194_p5), %v2613_v61, %v2597_v23 }
 0x16d   : > { %935 = sbr.rel (%p1194_p5) target bundleno = 383 (0x17f), region = 44 }
 0x16e   : > { %v937_v36 = vshrl.u32 (!%p1194_p5), %v936_v53, 7  ;;  %v1034_v20 = vadd.f32 (!%p1194_p5), %v1033_v17, %v2628_v26 }
 0x170   : > { %v1035_v3 = vadd.f32 (!%p1194_p5), %v1034_v20, %v2636_v30  ;;  %v946_v10 = vadd.s32 (!%p1194_p5), 72, %v937_v36 }
 0x172   : > { %v1036_v39 = vadd.f32 (!%p1194_p5), %v1035_v3, %v2644_v6  ;;  %vm978_vm15 = vcmp.lt.s32.totalorder (!%p1194_p5), %v946_v10, 76 }
 0x173   : > { %v1010_v31 = vsel (!%p1194_p5), %vm978_vm15, %v2688_v60, 0.0 }
 0x174   : > { %v1037_v29 = vadd.f32 %v1036_v39, %v2656_v37 }
 0x176   : > { %v1038_v24 = vadd.f32 %v1037_v29, %v2664_v57 }
 0x178   : > { %v1039_v11 = vadd.f32 %v1038_v24, %v2672_v13 }
 0x17a   : > { %v1040_v42 = vadd.f32 %v1039_v11, %v2680_v35 }
 0x17c   : > { %v1041_v23 = vadd.f32 %v1040_v42, %v1010_v31 }
 0x17e   : > { %1064 = vst [vmem:[%s2787_s20] sm:$0xff] %v1041_v23 }
 0x17f PF: > { %s1196_s25 = sshll.u32 %s1545_s13, 7  ;;  %s1079_s5 = sshll.u32 %s2787_s20, 4  ;;  %s1080_s5 = int_to_ptr.vmem [resolvable:$true] %s1079_s5 }
 0x180   : > { %s2818_s4 = scalar_lea.hbm %s2858_s2, %s1196_s25  ;;  %s1066_s8 = scalar_lea.sflag [#allocation4], %s1674_s29 }
 0x181   : > { %s1430_s14 = scalar_lea.vmem %s1080_s5, 128  ;;  %p3296_p3 = scmp.ne.s32.totalorder %s2958_s21, 0 }
 0x182   : > { %p1431_p1 = scmp.ne.s32.totalorder %s1080_s5, %s1430_s14  ;;  %s1508_s16 = smov [#allocation7]  }
 0x183   : > { %s1434_s23 = sshll.u32 %s1508_s16, 4  ;;  %s1435_s23 = int_to_ptr.vmem [resolvable:$false] %s1434_s23 }
 0x184   : > { %p1432_p4 = pnand %p1431_p1, %p3296_p3  ;;  %s1436_s27 = scalar_lea.vmem %s1435_s23, 256 }
 0x185   : > { %p1437_p7 = scmp.lt.s32.totalorder %s1080_s5, %s1435_s23  ;;  %p1438_p9 = scmp.lt.s32.totalorder %s1436_s27, %s1430_s14 }
 0x186   : > { %p1433_p8 = pneg %p1432_p4 }
 0x187   : > { %p1439_p10 = por %p1438_p9, %p1437_p7 }
 0x189   : > { %p1440_p2 = pnand %p1439_p10, %p1433_p8 }
 0x18b   : > { %1443 = shalt.err (!%p1440_p2)
}
 0x18c   : > { %s1444_s13 = scalar_lea.hbm %s2818_s4, 128  ;;  %s1448_s6 = scalar_lea.hbm %s2858_s2, 384 }
 0x18d   : > { %p1445_p11 = scmp.ne.s32.totalorder %s2818_s4, %s1444_s13  ;;  %p1449_p0 = scmp.lt.u32.totalorder %s2818_s4, %s2858_s2 }
 0x18e   : > { %p1450_p6 = scmp.lt.u32.totalorder %s1448_s6, %s1444_s13  ;;  %p1452_p1 = scmp.lt.u32.totalorder %s1444_s13, %s2818_s4 }
 0x18f   : > { %p1446_p13 = pnand %p1445_p11, %p3296_p3 }
 0x190   : > { %p1451_p5 = por %p1450_p6, %p1449_p0 }
 0x191   : > { %p1447_p12 = pneg %p1446_p13 }
 0x192   : > { %p1453_p4 = por %p1452_p1, %p1451_p5 }
 0x194   : > { %p1454_p8 = pnand %p1453_p4, %p1447_p12 }
 0x196   : > { %1457 = shalt.err (!%p1454_p8)
}
 0x197   : > { %1203 = dma.vmem_to_hbm [thread:$0]  (%p3296_p3), %s1080_s5, 128, %s2818_s4, %s1066_s8  }
 0x198 PF: > { %p1209_p7 = scmp.ge.s32.totalorder %s1500_s12, 2  ;;  %s1091_s17 = sand.u32 1, %s1488_s9  }
 0x199   : > { %p3297_p9 = scmp.ne.s32.totalorder %s2959_s22, 0  ;;  %s1092_s24 = scalar_lea.sflag [#allocation4], %s1091_s17 }
 0x19b   : > { %p1206_p10 = pnand %p1209_p7, %p3297_p9 }
 0x19d   : > { %1483 = dma.done.wait (!%p1206_p10), %s1092_s24, 128  }
 0x19e   : > { %1485 = vsyncadd (!%p1206_p10), %s1092_s24, 4294967168  ;;  %p18_p2 = scmp.ge.s32.totalorder %s1549_s15, 5   ;;  %s3298_s9 = smov %s1492_s10 }
 0x19f   : > { %s3299_s10 = smov %s1496_s11  ;;  %s3300_s11 = smov %s1561_s18 }
 0x1a0   : > { %s3301_s12 = smov %s1549_s15  ;;  %20 = sbr.rel (!%p18_p2) target bundleno = 7 (0x7), region = 94 }
 0x1a7   :  { %1097 = vsyncpa [#allocation3], 1 }
 0x1a8   :  { %1099 = vsyncpa [#allocation3 + $0x1], 1 }
 0x1a9   :  { %1100 = vsyncpa [#allocation6], 1 }
 0x1aa   :  { %1102 = vsyncpa [#allocation6 + $0x1], 1 }
 0x1ab   :  { %1103 = vsyncpa [#allocation4], 1 }
 0x1ac   :  { %1105 = vsyncpa [#allocation4 + $0x1], 1 }

</bundles_post_ra>
